<compile_context>
chip_gen: v5e
topology: v5e:2x2
jax: 0.10.0
libtpu: 0.0.40
codegen_flags: <defaults>
</compile_context>

<pallas_src>
import functools
import math

import jax
import jax.numpy as jnp
from jax import lax
from jax.experimental import pallas as pl
from jax.experimental.pallas import tpu as pltpu

# -------------------- config (small synthetic shapes) --------------------
N_IMG = 2          # batch
C_IN = 16          # feature channels
H_F = 16           # feature map height
W_F = 16           # feature map width
IMG_H = 64         # image height (ImageList.image_sizes)
IMG_W = 64         # image width
ANCHOR_SIZES = (16.0, 32.0, 64.0)
ASPECT_RATIOS = (1.0,)
A = len(ANCHOR_SIZES) * len(ASPECT_RATIOS)   # anchors per location
PRE_NMS_TOP_N = {"training": 128, "testing": 128}
POST_NMS_TOP_N = {"training": 64, "testing": 64}
NMS_THRESH = 0.7
SCORE_THRESH = 0.0
MIN_SIZE = 1e-3
BBOX_XFORM_CLIP = math.log(1000.0 / 16.0)


# -------------------- Pallas kernel 1: RPN head + decode + sigmoid --------------------
def _rpn_head_decode_kernel(patches_ref, wc_ref, bc_ref, wh_ref, bh_ref, anc_ref,
                            prop_ref, score_ref, *, A_):
    # patches_ref: (1, 9C, HW) im2col patches, lane-dense (HW on lanes).
    p = patches_ref[0]                                                  # (9C, HW)
    # 3x3 conv (padding=1) as one MXU matmul + bias + ReLU.
    conv = jnp.dot(wc_ref[...], p, preferred_element_type=jnp.float32) + bc_ref[...]
    t = jnp.maximum(conv, 0.0)                                          # (C, HW)
    # cls (A rows) and bbox deltas (4A rows, coordinate-major: row = c*A + a) in one matmul.
    head = jnp.dot(wh_ref[...], t, preferred_element_type=jnp.float32) + bh_ref[...]
    cls = head[0:A_]                                                    # (A, HW)
    dx = head[A_:2 * A_]
    dy = head[2 * A_:3 * A_]
    dw = jnp.minimum(head[3 * A_:4 * A_], BBOX_XFORM_CLIP)
    dh = jnp.minimum(head[4 * A_:5 * A_], BBOX_XFORM_CLIP)

    # BoxCoder.decode with weights (1,1,1,1); anchors are coordinate-major (4A, HW).
    anc = anc_ref[...]
    ax1 = anc[0:A_]
    ay1 = anc[A_:2 * A_]
    ax2 = anc[2 * A_:3 * A_]
    ay2 = anc[3 * A_:4 * A_]
    widths = ax2 - ax1
    heights = ay2 - ay1
    ctr_x = ax1 + 0.5 * widths
    ctr_y = ay1 + 0.5 * heights
    pcx = dx * widths + ctr_x
    pcy = dy * heights + ctr_y
    pw = jnp.exp(dw) * widths
    ph = jnp.exp(dh) * heights

    prop_ref[0] = jnp.concatenate(
        [pcx - 0.5 * pw, pcy - 0.5 * ph, pcx + 0.5 * pw, pcy + 0.5 * ph], axis=0)
    score_ref[0] = jax.nn.sigmoid(cls)


def rpn_head_decode(patches_t, w_conv_t, b_conv, w_head_t, b_head, anchors_cm, A_):
    N, KC, HW = patches_t.shape
    C = w_conv_t.shape[0]
    kernel = functools.partial(_rpn_head_decode_kernel, A_=A_)
    prop, score = pl.pallas_call(
        kernel,
        out_shape=(jax.ShapeDtypeStruct((N, 4 * A_, HW), jnp.float32),
                   jax.ShapeDtypeStruct((N, A_, HW), jnp.float32)),
        grid=(N,),
        in_specs=[
            pl.BlockSpec((1, KC, HW), lambda n: (n, 0, 0)),      # im2col patches (per image)
            pl.BlockSpec((C, KC), lambda n: (0, 0)),             # conv weight (C, 9C)
            pl.BlockSpec((C, 1), lambda n: (0, 0)),              # conv bias
            pl.BlockSpec((5 * A_, C), lambda n: (0, 0)),         # fused cls+box weight
            pl.BlockSpec((5 * A_, 1), lambda n: (0, 0)),         # fused cls+box bias
            pl.BlockSpec((4 * A_, HW), lambda n: (0, 0)),        # anchors, coord-major
        ],
        out_specs=(pl.BlockSpec((1, 4 * A_, HW), lambda n: (n, 0, 0)),
                   pl.BlockSpec((1, A_, HW), lambda n: (n, 0, 0))),
        compiler_params=pltpu.CompilerParams(dimension_semantics=("parallel",)),
    )(patches_t, w_conv_t, b_conv, w_head_t, b_head, anchors_cm)
    return prop, score


# -------------------- Pallas kernel 2: pairwise IoU + greedy NMS (fused) --------------------
def _iou_nms_kernel(b_ref, bt_ref, valid_ref, keep_ref, iou_scr, *, K, thresh):
    b = b_ref[0]                                         # (K, 4)  -> per-box column layout
    bt = bt_ref[0]                                       # (4, K)  -> lane-dense row layout
    x1c, y1c, x2c, y2c = b[:, 0:1], b[:, 1:2], b[:, 2:3], b[:, 3:4]    # (K, 1)
    x1r, y1r, x2r, y2r = bt[0:1], bt[1:2], bt[2:3], bt[3:4]            # (1, K)
    area_c = (x2c - x1c) * (y2c - y1c)
    area_r = (x2r - x1r) * (y2r - y1r)
    iw = jnp.maximum(jnp.minimum(x2c, x2r) - jnp.maximum(x1c, x1r), 0.0)
    ih = jnp.maximum(jnp.minimum(y2c, y2r) - jnp.maximum(y1c, y1r), 0.0)
    inter = iw * ih
    # epsilon guards 0/0 for degenerate (fully clipped) boxes; valid boxes have union >> eps.
    iou_scr[...] = inter / jnp.maximum(area_c + area_r - inter, 1e-8)

    idx = lax.broadcasted_iota(jnp.int32, (1, K), 1)

    def body(i, keep):
        row = iou_scr[pl.ds(i, 1), :]                    # (1, K) IoU of box i vs all boxes
        hit = jnp.where((idx < i) & (keep > 0.5) & (row > thresh), 1.0, 0.0)
        sup = jnp.max(hit) > 0.5
        # keep[i] &= not suppressed; invalid boxes stay 0 and never suppress.
        return jnp.where((idx == i) & sup, 0.0, keep)

    keep_ref[0] = lax.fori_loop(0, K, body, valid_ref[0])


def iou_greedy_nms(boxes, valid, thresh):
    N, K, _ = boxes.shape
    boxes_t = jnp.transpose(boxes, (0, 2, 1))            # (N, 4, K) lane-dense
    valid_f = valid.astype(jnp.float32).reshape(N, 1, K)
    kernel = functools.partial(_iou_nms_kernel, K=K, thresh=thresh)
    keep_f = pl.pallas_call(
        kernel,
        out_shape=jax.ShapeDtypeStruct((N, 1, K), jnp.float32),
        grid=(N,),
        in_specs=[pl.BlockSpec((1, K, 4), lambda n: (n, 0, 0)),
                  pl.BlockSpec((1, 4, K), lambda n: (n, 0, 0)),
                  pl.BlockSpec((1, 1, K), lambda n: (n, 0, 0))],
        out_specs=pl.BlockSpec((1, 1, K), lambda n: (n, 0, 0)),
        scratch_shapes=[pltpu.VMEM((K, K), jnp.float32)],
        compiler_params=pltpu.CompilerParams(dimension_semantics=("parallel",)),
    )(boxes, boxes_t, valid_f)
    return keep_f.reshape(N, K) > 0.5


# -------------------- plain-JAX glue --------------------
def make_anchors(Hf, Wf, stride_h, stride_w, scales, aspect_ratios):
    # Mirrors torchvision AnchorGenerator.generate_anchors + grid_anchors (single level).
    scales = jnp.asarray(scales, jnp.float32)
    ars = jnp.asarray(aspect_ratios, jnp.float32)
    h_ratios = jnp.sqrt(ars)
    w_ratios = 1.0 / h_ratios
    ws = (w_ratios[:, None] * scales[None, :]).reshape(-1)
    hs = (h_ratios[:, None] * scales[None, :]).reshape(-1)
    base = jnp.round(jnp.stack([-ws, -hs, ws, hs], axis=1) / 2.0)         # (A,4)
    shifts_x = jnp.arange(Wf, dtype=jnp.float32) * stride_w
    shifts_y = jnp.arange(Hf, dtype=jnp.float32) * stride_h
    sy, sx = jnp.meshgrid(shifts_y, shifts_x, indexing="ij")
    sx, sy = sx.reshape(-1), sy.reshape(-1)
    shifts = jnp.stack([sx, sy, sx, sy], axis=1)                          # (HW,4)
    return (shifts[:, None, :] + base[None, :, :]).reshape(-1, 4)         # (HW*A,4)


def _kernel_params(params, A_):
    # Convert torch-layout weights to the lane-dense kernel layout.
    c_out, c_in = params["w_conv"].shape[0], params["w_conv"].shape[1]
    # 3x3 conv weight (Cout, Cin, 3, 3) -> (Cout, 9*Cin) with column index (dy*3+dx)*Cin + cin.
    w_conv_t = jnp.transpose(params["w_conv"], (0, 2, 3, 1)).reshape(c_out, 9 * c_in)
    b_conv = params["b_conv"].reshape(c_out, 1)
    w_cls_t = params["w_cls"].reshape(A_, c_in)
    b_cls = params["b_cls"].reshape(A_, 1)
    # torchvision box channels are anchor-major (a*4 + c); reorder to coord-major rows (c*A + a).
    w_box_cm = params["w_box"].reshape(A_, 4, c_in).transpose(1, 0, 2).reshape(4 * A_, c_in)
    b_box_cm = params["b_box"].reshape(A_, 4).T.reshape(4 * A_, 1)
    w_head_t = jnp.concatenate([w_cls_t, w_box_cm], axis=0)               # (5A, C)
    b_head = jnp.concatenate([b_cls, b_box_cm], axis=0)                   # (5A, 1)
    return w_conv_t, b_conv, w_head_t, b_head


def _select_post_nms(boxes, scores, keep, *, post_n):
    # Fixed-shape stand-in for torch's dynamic keep[:post_nms_top_n] gather.
    order = jnp.argsort(jnp.logical_not(keep).astype(jnp.int32))[:post_n]  # stable: kept first, score order
    num_keep = jnp.minimum(jnp.sum(keep.astype(jnp.int32)), post_n)
    ob = boxes[order]
    osc = scores[order]
    valid = jnp.arange(post_n) < num_keep
    return (jnp.where(valid[:, None], ob, 0.0),
            jnp.where(valid, osc, 0.0),
            num_keep)


def rpn_forward(x_nchw, params, anchors_flat):
    """Eval-mode RPN forward. Returns (boxes, scores, num_keep, losses) where
    losses == proposals_and_obj_pre_nms (as in the torch module in eval mode)."""
    N, C, Hf, Wf = x_nchw.shape
    HW = Hf * Wf
    A_ = params["w_cls"].shape[0]
    HWA = HW * A_

    # im2col (3x3, pad=1, stride=1) -> lane-dense (N, 9C, HW) patches for the head kernel.
    x_nhwc = jnp.transpose(x_nchw, (0, 2, 3, 1))
    x_pad = jnp.pad(x_nhwc, ((0, 0), (1, 1), (1, 1), (0, 0)))
    cols = [x_pad[:, dy:dy + Hf, dx:dx + Wf, :] for dy in range(3) for dx in range(3)]
    patches = jnp.concatenate(cols, axis=-1).reshape(N, HW, 9 * C)
    patches_t = jnp.transpose(patches, (0, 2, 1))                          # (N, 9C, HW)

    w_conv_t, b_conv, w_head_t, b_head = _kernel_params(params, A_)

    # Anchors (HW*A, 4) -> coordinate-major (4A, HW): row c*A + a, lanes = spatial index.
    anchors_cm = anchors_flat.reshape(HW, A_, 4).transpose(2, 1, 0).reshape(4 * A_, HW)

    # Fused head + decode + sigmoid (Pallas).
    prop_cm, score_am = rpn_head_decode(patches_t, w_conv_t, b_conv,
                                        w_head_t, b_head, anchors_cm, A_)

    # Back to torch's (N, HWA, 4) / (N, HWA) ordering (spatial-major, anchor-minor).
    proposals = prop_cm.reshape(N, 4, A_, HW).transpose(0, 3, 2, 1).reshape(N, HWA, 4)
    prob_all = jnp.transpose(score_am, (0, 2, 1)).reshape(N, HWA)

    # filter_proposals: per-level top-k (single level); sigmoid is monotonic, so top-k on
    # probabilities selects the same anchors as top-k on logits.
    k = min(PRE_NMS_TOP_N["testing"], HWA)
    scores_top, top_idx = lax.top_k(prob_all, k)                           # (N, k) desc
    props_top = jnp.take_along_axis(proposals, top_idx[:, :, None], axis=1)

    # clip_boxes_to_image
    x1 = jnp.clip(props_top[..., 0], 0.0, float(IMG_W))
    y1 = jnp.clip(props_top[..., 1], 0.0, float(IMG_H))
    x2 = jnp.clip(props_top[..., 2], 0.0, float(IMG_W))
    y2 = jnp.clip(props_top[..., 3], 0.0, float(IMG_H))
    clipped = jnp.stack([x1, y1, x2, y2], axis=-1)

    # remove_small_boxes + score_thresh as a validity mask.
    ws, hs = x2 - x1, y2 - y1
    valid = (ws >= MIN_SIZE) & (hs >= MIN_SIZE) & (scores_top >= SCORE_THRESH)

    # batched_nms (single level -> plain NMS): fused IoU + greedy NMS in Pallas.
    keep = iou_greedy_nms(clipped, valid, NMS_THRESH)                      # (N, k) bool

    post_n = POST_NMS_TOP_N["testing"]
    final_boxes, final_scores, num_keep = jax.vmap(
        functools.partial(_select_post_nms, post_n=post_n))(clipped, scores_top, keep)

    # eval mode: losses = proposals_and_obj_pre_nms
    losses = {"proposals": props_top, "objectness": scores_top}
    # TODO(synk): training-mode branch (assign_targets_to_anchors / compute_loss) is not
    # exercised by the eval forward pass and is not implemented here.
    return final_boxes, final_scores, num_keep, losses


# -------------------- main --------------------
if __name__ == "__main__":
    key = jax.random.PRNGKey(0)
    kx, k1, k2, k3 = jax.random.split(key, 4)
    # Deterministic synthetic parameters in torchvision layout (RPNHead init: N(0, 0.01), bias 0).
    params = {
        "w_conv": 0.01 * jax.random.normal(k1, (C_IN, C_IN, 3, 3), jnp.float32),
        "b_conv": jnp.zeros((C_IN,), jnp.float32),
        "w_cls": 0.01 * jax.random.normal(k2, (A, C_IN, 1, 1), jnp.float32),
        "b_cls": jnp.zeros((A,), jnp.float32),
        "w_box": 0.01 * jax.random.normal(k3, (4 * A, C_IN, 1, 1), jnp.float32),
        "b_box": jnp.zeros((4 * A,), jnp.float32),
    }
    x = jax.random.normal(kx, (N_IMG, C_IN, H_F, W_F), jnp.float32)        # NCHW features
    anchors = make_anchors(H_F, W_F, IMG_H // H_F, IMG_W // W_F,
                           ANCHOR_SIZES, ASPECT_RATIOS)

    fwd = jax.jit(rpn_forward)
    boxes, scores, num_keep, losses = fwd(x, params, anchors)
    jax.block_until_ready((boxes, scores, num_keep, losses))
    print("KERNEL_OK")
</pallas_src>

<mosaic_0001>
module attributes {stable_mosaic.version = 11 : i64} {
  func.func @_rpn_head_decode_kernel(%arg0: i32, %arg1: memref<1x144x256xf32, #tpu.memory_space<vmem>>, %arg2: memref<16x144xf32, #tpu.memory_space<vmem>>, %arg3: memref<16x1xf32, #tpu.memory_space<vmem>>, %arg4: memref<15x16xf32, #tpu.memory_space<vmem>>, %arg5: memref<15x1xf32, #tpu.memory_space<vmem>>, %arg6: memref<12x256xf32, #tpu.memory_space<vmem>>, %arg7: memref<1x12x256xf32, #tpu.memory_space<vmem>>, %arg8: memref<1x3x256xf32, #tpu.memory_space<vmem>>) attributes {dimension_semantics = [#tpu.dimension_semantics<parallel>], iteration_bounds = array<i64: 2>, scalar_prefetch = 0 : i64, scratch_operands = 0 : i64, tpu.core_type = #tpu.core_type<tc>, window_params = [{transform_indices = @transform_0, window_bounds = array<i64: 1, 144, 256>}, {pipeline_mode = #tpu.pipeline_mode<synchronous>, transform_indices = @transform_1, window_bounds = array<i64: 16, 144>}, {pipeline_mode = #tpu.pipeline_mode<synchronous>, transform_indices = @transform_2, window_bounds = array<i64: 16, 1>}, {pipeline_mode = #tpu.pipeline_mode<synchronous>, transform_indices = @transform_3, window_bounds = array<i64: 15, 16>}, {pipeline_mode = #tpu.pipeline_mode<synchronous>, transform_indices = @transform_4, window_bounds = array<i64: 15, 1>}, {pipeline_mode = #tpu.pipeline_mode<synchronous>, transform_indices = @transform_5, window_bounds = array<i64: 12, 256>}, {transform_indices = @transform_6, window_bounds = array<i64: 1, 12, 256>}, {transform_indices = @transform_7, window_bounds = array<i64: 1, 3, 256>}]} {
    %c0 = arith.constant 0 : index
    %c0_0 = arith.constant 0 : index
    %c0_1 = arith.constant 0 : index
    %0 = vector.load %arg1[%c0, %c0_0, %c0_1] : memref<1x144x256xf32, #tpu.memory_space<vmem>>, vector<1x144x256xf32>
    %1 = vector.shape_cast %0 : vector<1x144x256xf32> to vector<144x256xf32>
    %c0_2 = arith.constant 0 : index
    %c0_3 = arith.constant 0 : index
    %2 = vector.load %arg2[%c0_2, %c0_3] : memref<16x144xf32, #tpu.memory_space<vmem>>, vector<16x144xf32>
    %cst = arith.constant dense<0.000000e+00> : vector<16x256xf32>
    %3 = tpu.matmul %2, %1, %cst {dimension_numbers = #tpu.dot_dimension_numbers<[1], [0], [0], [1], [0, 0, 1, 1], [], []>} : vector<16x144xf32>, vector<144x256xf32>, vector<16x256xf32> -> vector<16x256xf32>
    %c0_4 = arith.constant 0 : index
    %c0_5 = arith.constant 0 : index
    %4 = vector.load %arg3[%c0_4, %c0_5] : memref<16x1xf32, #tpu.memory_space<vmem>>, vector<16x1xf32>
    %5 = vector.broadcast %4 : vector<16x1xf32> to vector<16x256xf32>
    %6 = arith.addf %3, %5 : vector<16x256xf32>
    %cst_6 = arith.constant 0.000000e+00 : f32
    %7 = vector.broadcast %cst_6 : f32 to vector<16x256xf32>
    %8 = arith.maximumf %6, %7 : vector<16x256xf32>
    %c0_7 = arith.constant 0 : index
    %c0_8 = arith.constant 0 : index
    %9 = vector.load %arg4[%c0_7, %c0_8] : memref<15x16xf32, #tpu.memory_space<vmem>>, vector<15x16xf32>
    %cst_9 = arith.constant dense<0.000000e+00> : vector<15x256xf32>
    %10 = tpu.matmul %9, %8, %cst_9 {dimension_numbers = #tpu.dot_dimension_numbers<[1], [0], [0], [1], [0, 0, 1, 1], [], []>} : vector<15x16xf32>, vector<16x256xf32>, vector<15x256xf32> -> vector<15x256xf32>
    %c0_10 = arith.constant 0 : index
    %c0_11 = arith.constant 0 : index
    %11 = vector.load %arg5[%c0_10, %c0_11] : memref<15x1xf32, #tpu.memory_space<vmem>>, vector<15x1xf32>
    %12 = vector.broadcast %11 : vector<15x1xf32> to vector<15x256xf32>
    %13 = arith.addf %10, %12 : vector<15x256xf32>
    %14 = vector.extract_strided_slice %13 {offsets = [0, 0], sizes = [3, 256], strides = [1, 1]} : vector<15x256xf32> to vector<3x256xf32>
    %15 = vector.extract_strided_slice %13 {offsets = [3, 0], sizes = [3, 256], strides = [1, 1]} : vector<15x256xf32> to vector<3x256xf32>
    %16 = vector.extract_strided_slice %13 {offsets = [6, 0], sizes = [3, 256], strides = [1, 1]} : vector<15x256xf32> to vector<3x256xf32>
    %17 = vector.extract_strided_slice %13 {offsets = [9, 0], sizes = [3, 256], strides = [1, 1]} : vector<15x256xf32> to vector<3x256xf32>
    %cst_12 = arith.constant 4.13516665 : f32
    %18 = vector.broadcast %cst_12 : f32 to vector<3x256xf32>
    %19 = arith.minimumf %17, %18 : vector<3x256xf32>
    %20 = vector.extract_strided_slice %13 {offsets = [12, 0], sizes = [3, 256], strides = [1, 1]} : vector<15x256xf32> to vector<3x256xf32>
    %cst_13 = arith.constant 4.13516665 : f32
    %21 = vector.broadcast %cst_13 : f32 to vector<3x256xf32>
    %22 = arith.minimumf %20, %21 : vector<3x256xf32>
    %c0_14 = arith.constant 0 : index
    %c0_15 = arith.constant 0 : index
    %23 = vector.load %arg6[%c0_14, %c0_15] : memref<12x256xf32, #tpu.memory_space<vmem>>, vector<12x256xf32>
    %24 = vector.extract_strided_slice %23 {offsets = [0, 0], sizes = [3, 256], strides = [1, 1]} : vector<12x256xf32> to vector<3x256xf32>
    %25 = vector.extract_strided_slice %23 {offsets = [3, 0], sizes = [3, 256], strides = [1, 1]} : vector<12x256xf32> to vector<3x256xf32>
    %26 = vector.extract_strided_slice %23 {offsets = [6, 0], sizes = [3, 256], strides = [1, 1]} : vector<12x256xf32> to vector<3x256xf32>
    %27 = vector.extract_strided_slice %23 {offsets = [9, 0], sizes = [3, 256], strides = [1, 1]} : vector<12x256xf32> to vector<3x256xf32>
    %28 = arith.subf %26, %24 : vector<3x256xf32>
    %29 = arith.subf %27, %25 : vector<3x256xf32>
    %cst_16 = arith.constant 5.000000e-01 : f32
    %30 = vector.broadcast %cst_16 : f32 to vector<3x256xf32>
    %31 = arith.mulf %30, %28 : vector<3x256xf32>
    %32 = arith.addf %24, %31 : vector<3x256xf32>
    %cst_17 = arith.constant 5.000000e-01 : f32
    %33 = vector.broadcast %cst_17 : f32 to vector<3x256xf32>
    %34 = arith.mulf %33, %29 : vector<3x256xf32>
    %35 = arith.addf %25, %34 : vector<3x256xf32>
    %36 = arith.mulf %15, %28 : vector<3x256xf32>
    %37 = arith.addf %36, %32 : vector<3x256xf32>
    %38 = arith.mulf %16, %29 : vector<3x256xf32>
    %39 = arith.addf %38, %35 : vector<3x256xf32>
    %40 = math.exp %19 : vector<3x256xf32>
    %41 = arith.mulf %40, %28 : vector<3x256xf32>
    %42 = math.exp %22 : vector<3x256xf32>
    %43 = arith.mulf %42, %29 : vector<3x256xf32>
    %cst_18 = arith.constant 5.000000e-01 : f32
    %44 = vector.broadcast %cst_18 : f32 to vector<3x256xf32>
    %45 = arith.mulf %44, %41 : vector<3x256xf32>
    %46 = arith.subf %37, %45 : vector<3x256xf32>
    %cst_19 = arith.constant 5.000000e-01 : f32
    %47 = vector.broadcast %cst_19 : f32 to vector<3x256xf32>
    %48 = arith.mulf %47, %43 : vector<3x256xf32>
    %49 = arith.subf %39, %48 : vector<3x256xf32>
    %cst_20 = arith.constant 5.000000e-01 : f32
    %50 = vector.broadcast %cst_20 : f32 to vector<3x256xf32>
    %51 = arith.mulf %50, %41 : vector<3x256xf32>
    %52 = arith.addf %37, %51 : vector<3x256xf32>
    %cst_21 = arith.constant 5.000000e-01 : f32
    %53 = vector.broadcast %cst_21 : f32 to vector<3x256xf32>
    %54 = arith.mulf %53, %43 : vector<3x256xf32>
    %55 = arith.addf %39, %54 : vector<3x256xf32>
    %56 = tpu.concatenate %46, %49, %52, %55 in 0 : vector<3x256xf32>, vector<3x256xf32>, vector<3x256xf32>, vector<3x256xf32> -> vector<12x256xf32>
    %c0_22 = arith.constant 0 : index
    %c0_23 = arith.constant 0 : index
    %c0_24 = arith.constant 0 : index
    %57 = vector.load %arg7[%c0_22, %c0_23, %c0_24] : memref<1x12x256xf32, #tpu.memory_space<vmem>>, vector<1x12x256xf32>
    %58 = vector.shape_cast %57 : vector<1x12x256xf32> to vector<12x256xf32>
    %59 = vector.shape_cast %56 : vector<12x256xf32> to vector<1x12x256xf32>
    tpu.vector_store %arg7[%c0_22, %c0_23, %c0_24], %59 {strides = array<i32>} : memref<1x12x256xf32, #tpu.memory_space<vmem>>, vector<1x12x256xf32>,
    %60 = arith.negf %14 : vector<3x256xf32>
    %61 = math.exp %60 : vector<3x256xf32>
    %cst_25 = arith.constant 1.000000e+00 : f32
    %62 = vector.broadcast %cst_25 : f32 to vector<3x256xf32>
    %63 = arith.addf %62, %61 : vector<3x256xf32>
    %64 = arith.divf %62, %63 : vector<3x256xf32>
    %c0_26 = arith.constant 0 : index
    %c0_27 = arith.constant 0 : index
    %c0_28 = arith.constant 0 : index
    %65 = vector.load %arg8[%c0_26, %c0_27, %c0_28] : memref<1x3x256xf32, #tpu.memory_space<vmem>>, vector<1x3x256xf32>
    %66 = vector.shape_cast %65 : vector<1x3x256xf32> to vector<3x256xf32>
    %67 = vector.shape_cast %64 : vector<3x256xf32> to vector<1x3x256xf32>
    tpu.vector_store %arg8[%c0_26, %c0_27, %c0_28], %67 {strides = array<i32>} : memref<1x3x256xf32, #tpu.memory_space<vmem>>, vector<1x3x256xf32>,
    return
  }
  func.func @transform_0(%arg0: i32) -> (i32, i32, i32) {
    %c0_i32 = arith.constant 0 : i32
    %c0_i32_0 = arith.constant 0 : i32
    %c0_i32_1 = arith.constant 0 : i32
    return %arg0, %c0_i32, %c0_i32_0 : i32, i32, i32
  }
  func.func @transform_1(%arg0: i32) -> (i32, i32) {
    %c0_i32 = arith.constant 0 : i32
    %c0_i32_0 = arith.constant 0 : i32
    %c0_i32_1 = arith.constant 0 : i32
    return %c0_i32, %c0_i32_0 : i32, i32
  }
  func.func @transform_2(%arg0: i32) -> (i32, i32) {
    %c0_i32 = arith.constant 0 : i32
    %c0_i32_0 = arith.constant 0 : i32
    %c0_i32_1 = arith.constant 0 : i32
    return %c0_i32, %c0_i32_0 : i32, i32
  }
  func.func @transform_3(%arg0: i32) -> (i32, i32) {
    %c0_i32 = arith.constant 0 : i32
    %c0_i32_0 = arith.constant 0 : i32
    %c0_i32_1 = arith.constant 0 : i32
    return %c0_i32, %c0_i32_0 : i32, i32
  }
  func.func @transform_4(%arg0: i32) -> (i32, i32) {
    %c0_i32 = arith.constant 0 : i32
    %c0_i32_0 = arith.constant 0 : i32
    %c0_i32_1 = arith.constant 0 : i32
    return %c0_i32, %c0_i32_0 : i32, i32
  }
  func.func @transform_5(%arg0: i32) -> (i32, i32) {
    %c0_i32 = arith.constant 0 : i32
    %c0_i32_0 = arith.constant 0 : i32
    %c0_i32_1 = arith.constant 0 : i32
    return %c0_i32, %c0_i32_0 : i32, i32
  }
  func.func @transform_6(%arg0: i32) -> (i32, i32, i32) {
    %c0_i32 = arith.constant 0 : i32
    %c0_i32_0 = arith.constant 0 : i32
    %c0_i32_1 = arith.constant 0 : i32
    return %arg0, %c0_i32, %c0_i32_0 : i32, i32, i32
  }
  func.func @transform_7(%arg0: i32) -> (i32, i32, i32) {
    %c0_i32 = arith.constant 0 : i32
    %c0_i32_0 = arith.constant 0 : i32
    %c0_i32_1 = arith.constant 0 : i32
    return %arg0, %c0_i32, %c0_i32_0 : i32, i32, i32
  }
}

module attributes {stable_mosaic.version = 11 : i64} {
  func.func @_iou_nms_kernel(%arg0: i32, %arg1: memref<1x128x4xf32, #tpu.memory_space<vmem>>, %arg2: memref<1x4x128xf32, #tpu.memory_space<vmem>>, %arg3: memref<1x1x128xf32, #tpu.memory_space<vmem>>, %arg4: memref<1x1x128xf32, #tpu.memory_space<vmem>>, %arg5: memref<128x128xf32, #tpu.memory_space<vmem>>) attributes {dimension_semantics = [#tpu.dimension_semantics<parallel>], iteration_bounds = array<i64: 2>, scalar_prefetch = 0 : i64, scratch_operands = 1 : i64, tpu.core_type = #tpu.core_type<tc>, window_params = [{transform_indices = @transform_0, window_bounds = array<i64: 1, 128, 4>}, {transform_indices = @transform_1, window_bounds = array<i64: 1, 4, 128>}, {transform_indices = @transform_2, window_bounds = array<i64: 1, 1, 128>}, {transform_indices = @transform_3, window_bounds = array<i64: 1, 1, 128>}]} {
    %c0 = arith.constant 0 : index
    %c0_0 = arith.constant 0 : index
    %c0_1 = arith.constant 0 : index
    %0 = vector.load %arg1[%c0, %c0_0, %c0_1] : memref<1x128x4xf32, #tpu.memory_space<vmem>>, vector<1x128x4xf32>
    %1 = vector.shape_cast %0 : vector<1x128x4xf32> to vector<128x4xf32>
    %c0_2 = arith.constant 0 : index
    %c0_3 = arith.constant 0 : index
    %c0_4 = arith.constant 0 : index
    %2 = vector.load %arg2[%c0_2, %c0_3, %c0_4] : memref<1x4x128xf32, #tpu.memory_space<vmem>>, vector<1x4x128xf32>
    %3 = vector.shape_cast %2 : vector<1x4x128xf32> to vector<4x128xf32>
    %4 = vector.extract_strided_slice %1 {offsets = [0, 0], sizes = [128, 1], strides = [1, 1]} : vector<128x4xf32> to vector<128x1xf32>
    %5 = vector.extract_strided_slice %1 {offsets = [0, 1], sizes = [128, 1], strides = [1, 1]} : vector<128x4xf32> to vector<128x1xf32>
    %6 = vector.extract_strided_slice %1 {offsets = [0, 2], sizes = [128, 1], strides = [1, 1]} : vector<128x4xf32> to vector<128x1xf32>
    %7 = vector.extract_strided_slice %1 {offsets = [0, 3], sizes = [128, 1], strides = [1, 1]} : vector<128x4xf32> to vector<128x1xf32>
    %8 = vector.extract_strided_slice %3 {offsets = [0, 0], sizes = [1, 128], strides = [1, 1]} : vector<4x128xf32> to vector<1x128xf32>
    %9 = vector.extract_strided_slice %3 {offsets = [1, 0], sizes = [1, 128], strides = [1, 1]} : vector<4x128xf32> to vector<1x128xf32>
    %10 = vector.extract_strided_slice %3 {offsets = [2, 0], sizes = [1, 128], strides = [1, 1]} : vector<4x128xf32> to vector<1x128xf32>
    %11 = vector.extract_strided_slice %3 {offsets = [3, 0], sizes = [1, 128], strides = [1, 1]} : vector<4x128xf32> to vector<1x128xf32>
    %12 = arith.subf %6, %4 : vector<128x1xf32>
    %13 = arith.subf %7, %5 : vector<128x1xf32>
    %14 = arith.mulf %12, %13 : vector<128x1xf32>
    %15 = arith.subf %10, %8 : vector<1x128xf32>
    %16 = arith.subf %11, %9 : vector<1x128xf32>
    %17 = arith.mulf %15, %16 : vector<1x128xf32>
    %18 = vector.broadcast %6 : vector<128x1xf32> to vector<128x128xf32>
    %19 = vector.broadcast %10 : vector<1x128xf32> to vector<128x128xf32>
    %20 = arith.minimumf %18, %19 : vector<128x128xf32>
    %21 = vector.broadcast %4 : vector<128x1xf32> to vector<128x128xf32>
    %22 = vector.broadcast %8 : vector<1x128xf32> to vector<128x128xf32>
    %23 = arith.maximumf %21, %22 : vector<128x128xf32>
    %24 = arith.subf %20, %23 : vector<128x128xf32>
    %cst = arith.constant 0.000000e+00 : f32
    %25 = vector.broadcast %cst : f32 to vector<128x128xf32>
    %26 = arith.maximumf %24, %25 : vector<128x128xf32>
    %27 = vector.broadcast %7 : vector<128x1xf32> to vector<128x128xf32>
    %28 = vector.broadcast %11 : vector<1x128xf32> to vector<128x128xf32>
    %29 = arith.minimumf %27, %28 : vector<128x128xf32>
    %30 = vector.broadcast %5 : vector<128x1xf32> to vector<128x128xf32>
    %31 = vector.broadcast %9 : vector<1x128xf32> to vector<128x128xf32>
    %32 = arith.maximumf %30, %31 : vector<128x128xf32>
    %33 = arith.subf %29, %32 : vector<128x128xf32>
    %cst_5 = arith.constant 0.000000e+00 : f32
    %34 = vector.broadcast %cst_5 : f32 to vector<128x128xf32>
    %35 = arith.maximumf %33, %34 : vector<128x128xf32>
    %36 = arith.mulf %26, %35 : vector<128x128xf32>
    %37 = vector.broadcast %14 : vector<128x1xf32> to vector<128x128xf32>
    %38 = vector.broadcast %17 : vector<1x128xf32> to vector<128x128xf32>
    %39 = arith.addf %37, %38 : vector<128x128xf32>
    %40 = arith.subf %39, %36 : vector<128x128xf32>
    %cst_6 = arith.constant 9.99999993E-9 : f32
    %41 = vector.broadcast %cst_6 : f32 to vector<128x128xf32>
    %42 = arith.maximumf %40, %41 : vector<128x128xf32>
    %43 = arith.divf %36, %42 : vector<128x128xf32>
    %c0_7 = arith.constant 0 : index
    %c0_8 = arith.constant 0 : index
    %44 = vector.load %arg5[%c0_7, %c0_8] : memref<128x128xf32, #tpu.memory_space<vmem>>, vector<128x128xf32>
    tpu.vector_store %arg5[%c0_7, %c0_8], %43 {strides = array<i32>} : memref<128x128xf32, #tpu.memory_space<vmem>>, vector<128x128xf32>,
    %45 = tpu.iota {dimensions = array<i32: 1>} : vector<1x128xi32>
    %c0_9 = arith.constant 0 : index
    %c0_10 = arith.constant 0 : index
    %c0_11 = arith.constant 0 : index
    %46 = vector.load %arg3[%c0_9, %c0_10, %c0_11] : memref<1x1x128xf32, #tpu.memory_space<vmem>>, vector<1x1x128xf32>
    %47 = vector.shape_cast %46 : vector<1x1x128xf32> to vector<1x128xf32>
    %c0_i32 = arith.constant 0 : i32
    %c128_i32 = arith.constant 128 : i32
    %48 = arith.addi %c0_i32, %c128_i32 : i32
    %c1_i32 = arith.constant 1 : i32
    %49 = scf.for %arg6 = %c0_i32 to %48 step %c1_i32 iter_args(%arg7 = %47) -> (vector<1x128xf32>)  : i32 {
      %53 = arith.index_cast %arg6 : i32 to index
      %c0_16 = arith.constant 0 : index
      %54 = vector.load %arg5[%53, %c0_16] : memref<128x128xf32, #tpu.memory_space<vmem>>, vector<1x128xf32>
      %55 = vector.broadcast %arg6 : i32 to vector<1x128xi32>
      %56 = arith.cmpi slt, %45, %55 : vector<1x128xi32>
      %cst_17 = arith.constant 5.000000e-01 : f32
      %57 = vector.broadcast %cst_17 : f32 to vector<1x128xf32>
      %58 = arith.cmpf ogt, %arg7, %57 : vector<1x128xf32>
      %59 = arith.andi %56, %58 : vector<1x128xi1>
      %cst_18 = arith.constant 0.699999988 : f32
      %60 = vector.broadcast %cst_18 : f32 to vector<1x128xf32>
      %61 = arith.cmpf ogt, %54, %60 : vector<1x128xf32>
      %62 = arith.andi %59, %61 : vector<1x128xi1>
      %cst_19 = arith.constant 1.000000e+00 : f32
      %cst_20 = arith.constant 0.000000e+00 : f32
      %63 = vector.broadcast %cst_19 : f32 to vector<1x128xf32>
      %64 = vector.broadcast %cst_20 : f32 to vector<1x128xf32>
      %65 = arith.select %62, %63, %64 : vector<1x128xi1>, vector<1x128xf32>
      %66 = vector.shape_cast %65 : vector<1x128xf32> to vector<1x1x128xf32>
      %cst_21 = arith.constant dense<0xFF800000> : vector<1xf32>
      %67 = vector.multi_reduction <maximumf>, %66, %cst_21 [1, 2] : vector<1x1x128xf32> to vector<1xf32>
      %68 = vector.shape_cast %67 : vector<1xf32> to vector<1x1x1xf32>
      %69 = vector.extract %68[0, 0, 0] : f32 from vector<1x1x1xf32>
      %cst_22 = arith.constant 5.000000e-01 : f32
      %70 = arith.cmpf ogt, %69, %cst_22 : f32
      %71 = vector.broadcast %arg6 : i32 to vector<1x128xi32>
      %72 = arith.cmpi eq, %45, %71 : vector<1x128xi32>
      %73 = vector.broadcast %70 : i1 to vector<1x128xi1>
      %74 = arith.andi %72, %73 : vector<1x128xi1>
      %cst_23 = arith.constant 0.000000e+00 : f32
      %75 = vector.broadcast %cst_23 : f32 to vector<1x128xf32>
      %76 = arith.select %74, %75, %arg7 : vector<1x128xi1>, vector<1x128xf32>
      scf.yield %76 : vector<1x128xf32>
    }
    %c128_i32_12 = arith.constant 128 : i32
    %c0_13 = arith.constant 0 : index
    %c0_14 = arith.constant 0 : index
    %c0_15 = arith.constant 0 : index
    %50 = vector.load %arg4[%c0_13, %c0_14, %c0_15] : memref<1x1x128xf32, #tpu.memory_space<vmem>>, vector<1x1x128xf32>
    %51 = vector.shape_cast %50 : vector<1x1x128xf32> to vector<1x128xf32>
    %52 = vector.shape_cast %49 : vector<1x128xf32> to vector<1x1x128xf32>
    tpu.vector_store %arg4[%c0_13, %c0_14, %c0_15], %52 {strides = array<i32>} : memref<1x1x128xf32, #tpu.memory_space<vmem>>, vector<1x1x128xf32>,
    return
  }
  func.func @transform_0(%arg0: i32) -> (i32, i32, i32) {
    %c0_i32 = arith.constant 0 : i32
    %c0_i32_0 = arith.constant 0 : i32
    %c0_i32_1 = arith.constant 0 : i32
    return %arg0, %c0_i32, %c0_i32_0 : i32, i32, i32
  }
  func.func @transform_1(%arg0: i32) -> (i32, i32, i32) {
    %c0_i32 = arith.constant 0 : i32
    %c0_i32_0 = arith.constant 0 : i32
    %c0_i32_1 = arith.constant 0 : i32
    return %arg0, %c0_i32, %c0_i32_0 : i32, i32, i32
  }
  func.func @transform_2(%arg0: i32) -> (i32, i32, i32) {
    %c0_i32 = arith.constant 0 : i32
    %c0_i32_0 = arith.constant 0 : i32
    %c0_i32_1 = arith.constant 0 : i32
    return %arg0, %c0_i32, %c0_i32_0 : i32, i32, i32
  }
  func.func @transform_3(%arg0: i32) -> (i32, i32, i32) {
    %c0_i32 = arith.constant 0 : i32
    %c0_i32_0 = arith.constant 0 : i32
    %c0_i32_1 = arith.constant 0 : i32
    return %arg0, %c0_i32, %c0_i32_0 : i32, i32, i32
  }
}

</mosaic_0001>

<bundles_post_ra>
// kernel: rpn_forward.2
= control target key start
LH: loop header
LB: loop body
LE: loop exit
PB: predicated region body
PF: predicated region fallthrough
CT: control target
= control target key end

     0   :  { %s916_s24 = smov 0   ;;  %s1115_s0 = inlined_call_operand.vmem [shape: f32[2,144,256], index: 0, kind: input, shape index: {}]   ;;  %s1116_s1 = inlined_call_operand.vmem [shape: f32[16,144], index: 1, kind: input, shape index: {}]   ;;  %s1117_s2 = inlined_call_operand.vmem [shape: f32[16,1], index: 2, kind: input, shape index: {}]   ;;  %s1118_s3 = inlined_call_operand.vmem [shape: f32[15,16], index: 3, kind: input, shape index: {}]   ;;  %s1119_s4 = inlined_call_operand.vmem [shape: f32[15,1], index: 4, kind: input, shape index: {}]   ;;  %s1120_s5 = inlined_call_operand.vmem [shape: f32[12,256], index: 5, kind: input, shape index: {}]   ;;  %s1121_s6 = inlined_call_operand.vmem [shape: f32[2,12,256], index: 6, kind: output, shape index: {0}]   ;;  %s1122_s7 = inlined_call_operand.vmem [shape: f32[2,3,256], index: 7, kind: output, shape index: {1}]  }
   0x1 LB: > { %s819_s25 = sadd.s32 4294967295, %s873_s24   ;;  %p823_p0 = scmp.ge.s32.totalorder %s873_s24, 1  ;;  %s873_s24 = sphi %s916_s24, %s18_s24  }
   0x2   : > { %p240_p1 = scmp.lt.s32.totalorder %s873_s24, 3 }
   0x4   : > { %p241_p2 = pnand %p823_p0, %p240_p1 }
   0x5   : > { %p277_p3 = scmp.lt.s32.totalorder (!%p241_p2), %s819_s25, 1 }
   0x6   : > { %244 = sbr.rel (%p241_p2) target bundleno = 364 (0x16c), region = 44 }
   0xb   : > { %s1128_s25 = smov (!%p277_p3, %s819_s25), 1  ;;  %v875_v6 = vmov 0   ;;  %v329_v21 = vld [vmem:[%s1116_s1 + $0x8] sm:$0xff]  ;;  %vm344_vm0 = vcmask 130048   ;;  %v331_v31 = vld [vmem:[%s1116_s1 + $0x18] sm:$0xff]  ;;  %v332_v34 = vld [vmem:[%s1117_s2] sm:$0xff] }
   0xc   : > { %s843_s26 = smul.u32 288, %s1128_s25  ;;  %853 = vset.pattern.permute.xlu0 %v875_v6  ;;  %854 = vset.pattern.permute.xlu1 %v875_v6  ;;  %v333_v24 = vld [vmem:[%s1117_s2 + $0x8] sm:$0xff]  ;;  %v328_v41 = vld [vmem:[%s1116_s1] sm:$0xff]  ;;  %v330_v42 = vld [vmem:[%s1116_s1 + $0x10] sm:$0xff]  ;;  %vm537_vm1 = vcmask 1041408   ;;  %vm556_vm2 = vcmask 1044480  }
   0xd   : > { %341 = vperm.xlu0 %853, %v333_v24   ;;  %v449_v43 = vld [vmem:[%s1119_s4] sm:$0xff]  ;;  %v450_v47 = vld [vmem:[%s1119_s4 + $0x8] sm:$0x7f]  ;;  %vm595_vm3 = vcmask 1042432   ;;  %vm676_vm4 = vcmask 1045504   ;;  %vm679_vm5 = vcmask 1040384  }
   0xe   : > { %s930_s29 = scalar_lea.vmem %s1115_s0, %s843_s26  ;;  %453 = vperm.xlu1 %854, %v449_v43   ;;  %v447_v63 = vld [vmem:[%s1118_s3] sm:$0xff]  ;;  %v516_v6 = vld [vmem:[%s1120_s5 + $0x8] sm:$0xff]  ;;  %s841_s14 = sshll.u32 %s1128_s25, 5  ;;  %vm727_vm8 = vcmask 1043456  }
   0xf   : > { %v323_v0 = vld [vmem:[%s930_s29 + $0xf8] sm:$0xff]  ;;  %v322_v1 = vld [vmem:[%s930_s29 + $0xf0] sm:$0xff]  ;;  %v321_v2 = vld [vmem:[%s930_s29 + $0xe8] sm:$0xff]  ;;  %s1063_s17 = scalar_lea.vmem %s1121_s6, %s841_s14  ;;  %s842_s18 = sshll.u32 %s1128_s25, 3 }
  0x10   : > { %397 = vmatpush.msra.mxu2 %v323_v0  ;;  %351 = vmatpush.msra.mxu0 %v322_v1  ;;  %v320_v3 = vld [vmem:[%s930_s29 + $0xe0] sm:$0xff]  ;;  %v319_v4 = vld [vmem:[%s930_s29 + $0xd8] sm:$0xff]  ;;  %v318_v5 = vld [vmem:[%s930_s29 + $0xd0] sm:$0xff]  ;;  %s291_s21 = scalar_lea.vmem %s1122_s7, %s842_s18 }
  0x11   : > { %v317_v7 = vld [vmem:[%s930_s29 + $0xc8] sm:$0xff]  ;;  %v316_v8 = vld [vmem:[%s930_s29 + $0xc0] sm:$0xff]  ;;  %v315_v9 = vld [vmem:[%s930_s29 + $0xb8] sm:$0xff] }
  0x12   : > { %398 = vmatpush.msra.mxu2 %v321_v2  ;;  %352 = vmatpush.msra.mxu0 %v320_v3  ;;  %v314_v10 = vld [vmem:[%s930_s29 + $0xb0] sm:$0xff]  ;;  %v313_v11 = vld [vmem:[%s930_s29 + $0xa8] sm:$0xff]  ;;  %v312_v12 = vld [vmem:[%s930_s29 + $0xa0] sm:$0xff] }
  0x13   : > { %v311_v13 = vld [vmem:[%s930_s29 + $0x98] sm:$0xff]  ;;  %v310_v14 = vld [vmem:[%s930_s29 + $0x90] sm:$0xff]  ;;  %v325_v17 = vld [vmem:[%s930_s29 + $0x108] sm:$0xff] }
  0x14   : > { %399 = vmatpush.msra.mxu2 %v319_v4  ;;  %353 = vmatpush.msra.mxu0 %v318_v5  ;;  %v327_v15 = vld [vmem:[%s930_s29 + $0x118] sm:$0xff]  ;;  %v326_v16 = vld [vmem:[%s930_s29 + $0x110] sm:$0xff]  ;;  %v309_v18 = vld [vmem:[%s930_s29 + $0x88] sm:$0xff] }
  0x15   : > { %v308_v19 = vld [vmem:[%s930_s29 + $0x80] sm:$0xff]  ;;  %434 = vmatpush.msra.mxu3 %v327_v15  ;;  %388 = vmatpush.msra.mxu1 %v326_v16  ;;  %v307_v22 = vld [vmem:[%s930_s29 + $0x78] sm:$0xff]  ;;  %v306_v23 = vld [vmem:[%s930_s29 + $0x70] sm:$0xff] }
  0x16   : > { %400 = vmatpush.msra.mxu2 %v317_v7  ;;  %354 = vmatpush.msra.mxu0 %v316_v8  ;;  %v324_v20 = vld [vmem:[%s930_s29 + $0x100] sm:$0xff]  ;;  %v305_v25 = vld [vmem:[%s930_s29 + $0x68] sm:$0xff]  ;;  %v303_v27 = vld [vmem:[%s930_s29 + $0x58] sm:$0xff] }
  0x17   : > { %435 = vmatpush.msra.mxu3 %v325_v17  ;;  %389 = vmatpush.msra.mxu1 %v324_v20  ;;  %v304_v26 = vld [vmem:[%s930_s29 + $0x60] sm:$0xff]  ;;  %v302_v28 = vld [vmem:[%s930_s29 + $0x50] sm:$0xff]  ;;  %v301_v29 = vld [vmem:[%s930_s29 + $0x48] sm:$0xff] }
  0x18   : > { %401 = vmatpush.msra.mxu2 %v315_v9  ;;  %355 = vmatpush.msra.mxu0 %v314_v10  ;;  %v300_v30 = vld [vmem:[%s930_s29 + $0x40] sm:$0xff]  ;;  %v299_v32 = vld [vmem:[%s930_s29 + $0x38] sm:$0xff]  ;;  %v298_v33 = vld [vmem:[%s930_s29 + $0x30] sm:$0xff]  ;;  %v522_v10 = vrot.slane %v516_v6, 2 }
  0x19   : > { %831 = vmatmul.msk.f32.vlgmr.msra.gmra.mxu3 %vm344_vm0, %v329_v21  ;;  %829 = vmatmul.msk.f32.vlgmr.msra.gmra.mxu1 %vm344_vm0, %v329_v21  ;;  %v297_v35 = vld [vmem:[%s930_s29 + $0x28] sm:$0xff]  ;;  %v296_v36 = vld [vmem:[%s930_s29 + $0x20] sm:$0xff]  ;;  %v295_v37 = vld [vmem:[%s930_s29 + $0x18] sm:$0xff] }
  0x1a   : > { %402 = vmatpush.msra.mxu2 %v313_v11  ;;  %356 = vmatpush.msra.mxu0 %v312_v12  ;;  %v294_v38 = vld [vmem:[%s930_s29 + $0x10] sm:$0xff]  ;;  %v293_v39 = vld [vmem:[%s930_s29 + $0x8] sm:$0xff]  ;;  %v292_v40 = vld [vmem:[%s930_s29] sm:$0xff]  ;;  %v1018_v16 = vsub.f32 %v516_v6, %v522_v10 }
  0x1b   : > { %336 = vperm.xlu0 %853, %v332_v34   ;;  %458 = vperm.xlu1 %854, %v450_v47   ;;  %v448_v4 = vld [vmem:[%s1118_s3 + $0x8] sm:$0x7f]  ;;  %v515_v5 = vld [vmem:[%s1120_s5] sm:$0xff]  ;;  %v517_v9 = vld [vmem:[%s1120_s5 + $0x10] sm:$0xf] }
  0x1c   : > { %403 = vmatpush.msra.mxu2 %v311_v13  ;;  %357 = vmatpush.msra.mxu0 %v310_v14  ;;  %v521_v8 = vrot.slane %v515_v5, 2  ;;  %v518_v11 = vld [vmem:[%s1120_s5 + $0x18] sm:$0xf] }
  0x1d   : > { %v1020_v17 = vsub.f32 %v518_v11, %v522_v10 }
  0x1e   : > { %404 = vmatpush.msra.mxu2 %v309_v18  ;;  %358 = vmatpush.msra.mxu0 %v308_v19  ;;  %v525_v14 = vsub.f32 %v515_v5, %v521_v8  ;;  %v527_v15 = vsub.f32 %v517_v9, %v521_v8 }
  0x20   : > { %405 = vmatpush.msra.mxu2 %v307_v22  ;;  %359 = vmatpush.msra.mxu0 %v306_v23  ;;  %v529_v19 = vmul.f32 0.5, %v525_v14  ;;  %v531_v20 = vmul.f32 0.5, %v527_v15  ;;  %v530_v22 = vmul.f32 0.5, %v1018_v16  ;;  %v532_v23 = vmul.f32 0.5, %v1020_v17 }
  0x21   : > { %832 = vmatmul.msk.f32.gmra.mxu3 %vm344_vm0, %v331_v31  ;;  %830 = vmatmul.msk.f32.gmra.mxu1 %vm344_vm0, %v331_v31 }
  0x22   : > { %406 = vmatpush.msra.mxu2 %v305_v25  ;;  %360 = vmatpush.msra.mxu0 %v304_v26  ;;  %v538_v25 = vrot.slane %v529_v19, 6  ;;  %v539_v26 = vrot.slane %v531_v20, 6 }
  0x24   : > { %407 = vmatpush.msra.mxu2 %v303_v27  ;;  %361 = vmatpush.msra.mxu0 %v302_v28  ;;  %v541_v28 = vrot.slane %v530_v22, 6  ;;  %v540_v34 = vsel %vm537_vm1, %v538_v25, %v539_v26 }
  0x25   : > { %v546_v43 = vadd.f32 %v540_v34, %v515_v5 }
  0x26   : > { %408 = vmatpush.msra.mxu2 %v301_v29  ;;  %362 = vmatpush.msra.mxu0 %v300_v30  ;;  %v542_v29 = vrot.slane %v532_v23, 6 }
  0x28   : > { %409 = vmatpush.msra.mxu2 %v299_v32  ;;  %363 = vmatpush.msra.mxu0 %v298_v33 }
  0x2a   : > { %410 = vmatpush.msra.mxu2 %v297_v35  ;;  %364 = vmatpush.msra.mxu0 %v296_v36 }
  0x2c   : > { %411 = vmatpush.msra.mxu2 %v295_v37  ;;  %365 = vmatpush.msra.mxu0 %v294_v38  ;;  %v557_v37 = vrot.slane %v525_v14, 3  ;;  %v558_v38 = vrot.slane %v527_v15, 3 }
  0x2e   : > { %412 = vmatpush.msra.mxu2 %v293_v39  ;;  %366 = vmatpush.msra.mxu0 %v292_v40  ;;  %v543_v39 = vsel %vm537_vm1, %v541_v28, %v542_v29  ;;  %v596_v40 = vrot.slane %v525_v14, 5  ;;  %v559_v47 = vsel %vm556_vm2, %v557_v37, %v558_v38 }
  0x2f   : > { %413 = vmatmul.f32.vlgmr.msra.gmra.mxu2 %v328_v41  ;;  %367 = vmatmul.f32.vlgmr.msra.gmra.mxu0 %v328_v41  ;;  %v597_v41 = vrot.slane %v527_v15, 5 }
  0x37   : > { %416 = vmatmul.f32.gmra.mxu2 %v330_v42  ;;  %370 = vmatmul.f32.gmra.mxu0 %v330_v42 }
  0x7f   : > { %v342_v44 = vpop.permute.xlu0 %341 }
  0x80   : > { %v454_v7 = vpop.permute.xlu1 %453 }
  0x8d   : > { %v337_v49 = vpop.permute.xlu0 %336  ;;  %v459_v21 = vpop.permute.xlu1 %458 }
  0x96   : > { %v391_v45 = vpop.f32.mrf.mxu1 }
  0x9c   : > { %v437_v48 = vpop.f32.mrf.mxu3 }
  0x9e   : > { %v394_v53 = vpop.f32.mrf.mxu1 }
  0xa4   : > { %v440_v60 = vpop.f32.mrf.mxu3 }
  0xac   : > { %v368_v46 = vpop.f32.mrf.mxu0 }
  0xad   : > { %v369_v51 = vadd.f32 %v368_v46, %v337_v49  ;;  %v1032_v46 = vrot.slane %v1020_v17, 3 }
  0xaf   : > { %v392_v56 = vadd.f32 %v391_v45, %v369_v51  ;;  %v560_v45 = vrot.slane %v1018_v16, 3  ;;  %v569_v51 = vrot.slane %v546_v43, 5 }
  0xb1   : > { %v443_v62 = vmax.f32 %v392_v56, 0.0 }
  0xb2   : > { %v414_v50 = vpop.f32.mrf.mxu2 }
  0xb3   : > { %v415_v57 = vadd.f32 %v414_v50, %v337_v49  ;;  %v598_v49 = vsel %vm595_vm3, %v596_v40, %v597_v41 }
  0xb4   : > { %v371_v52 = vpop.f32.mrf.mxu0 }
  0xb5   : > { %v372_v54 = vadd.f32 %v371_v52, %v342_v44  ;;  %v438_v0 = vadd.f32 %v437_v48, %v415_v57  ;;  %v1035_v48 = vadd.f32 %v543_v39, %v516_v6 }
  0xb7   : > { %v395_v55 = vadd.f32 %v394_v53, %v372_v54  ;;  %v444_v3 = vmax.f32 %v438_v0, 0.0  ;;  %v1040_v54 = vadd.f32 %v542_v29, %v516_v6 }
  0xb9   : > { %v445_v58 = vmax.f32 %v395_v55, 0.0  ;;  %v584_v8 = vrot.slane %v1040_v54, 5 }
  0xba   : > { %v417_v59 = vpop.f32.mrf.mxu2 }
  0xbb   : > { %v418_v61 = vadd.f32 %v417_v59, %v342_v44  ;;  %481 = vmatpush.msrb.mxu1 %v445_v58  ;;  %v550_v44 = vadd.f32 %v539_v26, %v515_v5  ;;  %v562_v58 = vsel %vm556_vm2, %v560_v45, %v1032_v46 }
  0xbd   : > { %v441_v1 = vadd.f32 %v440_v60, %v418_v61  ;;  %482 = vmatpush.msrb.mxu1 %v443_v62  ;;  %v583_v52 = vrot.slane %v550_v44, 5 }
  0xbe   : > { %833 = vmatmul.msk.f32.vlgmr.msrb.gmra.mxu1 %vm344_vm0, %v447_v63 }
  0xbf   : > { %v446_v2 = vmax.f32 %v441_v1, 0.0 }
  0xc1   : > { %504 = vmatpush.msrb.mxu3 %v446_v2 }
  0xc3   : > { %505 = vmatpush.msrb.mxu3 %v444_v3  ;;  %v599_v3 = vrot.slane %v1018_v16, 5 }
  0xc4   : > { %835 = vmatmul.msk.f32.vlgmr.msrb.gmra.mxu3 %vm344_vm0, %v447_v63  ;;  %v570_v63 = vrot.slane %v1035_v48, 5 }
  0xc6   : > { %834 = vmatmul.msk.f32.gmra.mxu1 %vm344_vm0, %v448_v4 }
  0xcc   : > { %836 = vmatmul.msk.f32.gmra.mxu3 %vm344_vm0, %v448_v4  ;;  %v600_v4 = vrot.slane %v1020_v17, 5 }
  0xce   : > { %v601_v16 = vsel %vm595_vm3, %v599_v3, %v600_v4 }
 0x13b   : > { %v484_v12 = vpop.f32.mrf.mxu1 }
 0x13c   : > { %v485_v13 = vadd.f32 %v484_v12, %v454_v7 }
 0x13e   : > { %v837_v18 = vmul.f32 -1.442695, %v485_v13  ;;  %v565_v56 = vmul.f32 %v559_v47, %v485_v13  ;;  %v577_v57 = vmul.f32 %v558_v38, %v485_v13 }
 0x140   : > { %855 = vpow2.f32 %v837_v18  ;;  %v573_v9 = vadd.f32 %v569_v51, %v565_v56  ;;  %v587_v10 = vadd.f32 %v583_v52, %v577_v57 }
 0x143   : > { %v487_v24 = vpop.f32.mrf.mxu1 }
 0x144   : > { %v488_v27 = vadd.f32 %v487_v24, %v459_v21 }
 0x146   : > { %v856_v30 = vpop.eup %855  ;;  %v513_v31 = vmin.f32 %v488_v27, 4.1351666  ;;  %v579_v60 = vmul.f32 %v558_v38, %v488_v27 }
 0x147   : > { %v1024_v32 = vadd.f32 1.0, %v856_v30  ;;  %v507_v33 = vpop.f32.mrf.mxu3 }
 0x148   : > { %v591_v35 = vmul.f32 1.442695, %v513_v31  ;;  %v1026_v36 = vadd.f32 %v507_v33, %v454_v7  ;;  %v589_v12 = vadd.f32 %v583_v52, %v579_v60 }
 0x149   : > { %857 = vrcp.f32 %v1024_v32  ;;  %vm699_vm6 = vweird.f32 %v1024_v32  ;;  %v705_v24 = vand.u32 2147483648, %v1024_v32 }
 0x14a   : > { %859 = vpow2.f32 %v591_v35  ;;  %v838_v42 = vmul.f32 -1.442695, %v1026_v36  ;;  %v566_v35 = vmul.f32 %v562_v58, %v1026_v36  ;;  %v578_v37 = vmul.f32 %v1032_v46, %v1026_v36 }
 0x14c   : > { %861 = vpow2.f32 %v838_v42  ;;  %v574_v56 = vadd.f32 %v570_v63, %v566_v35  ;;  %v588_v58 = vadd.f32 %v584_v8, %v578_v37 }
 0x14f   : > { %v1038_v50 = vpop.eup %857  ;;  %v510_v53 = vpop.f32.mrf.mxu3 }
 0x150   : > { %v860_v55 = vpop.eup %859  ;;  %v511_v59 = vadd.f32 %v510_v53, %v459_v21  ;;  %v695_v1 = vmul.f32 %v1038_v50, %v1024_v32  ;;  %v703_v21 = vand.u32 2147483647, %v1024_v32  ;;  %vm700_vm7 = vweird.f32 %v1038_v50 }
 0x151   : > { %v604_v61 = vmul.f32 %v860_v55, %v598_v49  ;;  %v608_v62 = vmul.f32 %v860_v55, %v597_v41  ;;  %vm1082_vm9 = vmor %vm699_vm6, %vm700_vm7  ;;  %v706_v53 = vor.u32 1.1754944e-38, %v705_v24 }
 0x152   : > { %v862_v0 = vpop.eup %861  ;;  %v514_v2 = vmin.f32 %v511_v59, 4.1351666  ;;  %v696_v15 = vsub.f32 1.0, %v695_v1  ;;  %v580_v42 = vmul.f32 %v1032_v46, %v511_v59  ;;  %vm1086_vm10 = vcmp.eq.f32.partialorder %v703_v21, 8.507059e+37 }
 0x153   : > { %v610_v5 = vmul.f32 0.5, %v604_v61  ;;  %v620_v6 = vmul.f32 0.5, %v608_v62  ;;  %v1049_v7 = vadd.f32 1.0, %v862_v0 }
 0x154   : > { %v593_v11 = vmul.f32 1.442695, %v514_v2  ;;  %v697_v28 = vmul.f32 %v1038_v50, %v696_v15  ;;  %v590_v59 = vadd.f32 %v584_v8, %v580_v42 }
 0x155   : > { %v614_v13 = vrot.slane %v610_v5, 6  ;;  %v624_v14 = vrot.slane %v620_v6, 6  ;;  %863 = vrcp.f32 %v1049_v7  ;;  %v720_v51 = vand.u32 2147483648, %v1049_v7 }
 0x156   : > { %865 = vpow2.f32 %v593_v11  ;;  %v698_v49 = vadd.f32 %v1038_v50, %v697_v28  ;;  %v718_v32 = vand.u32 2147483647, %v1049_v7  ;;  %vm714_vm12 = vweird.f32 %v1049_v7 }
 0x157   : > { %v618_v17 = vsub.f32 %v573_v9, %v614_v13  ;;  %v628_v18 = vsub.f32 %v587_v10, %v624_v14  ;;  %v630_v19 = vsub.f32 %v589_v12, %v624_v14  ;;  %v632_v20 = vadd.f32 %v614_v13, %v573_v9 }
 0x158   : > { %v634_v22 = vadd.f32 %v624_v14, %v587_v10  ;;  %v636_v23 = vadd.f32 %v624_v14, %v589_v12  ;;  %v702_v62 = vsel %vm1082_vm9, %v1038_v50, %v698_v49  ;;  %v721_v1 = vor.u32 1.1754944e-38, %v720_v51 }
 0x159   : > { %v640_v25 = vrot.slane %v618_v17, 3  ;;  %v648_v26 = vrot.slane %v628_v18, 3  ;;  %v649_v27 = vrot.slane %v630_v19, 3  ;;  %v658_v29 = vrot.slane %v632_v20, 5 }
 0x15a   : > { %v666_v30 = vrot.slane %v634_v22, 5  ;;  %v667_v31 = vrot.slane %v636_v23, 5  ;;  %vm719_vm14 = vcmp.eq.f32.partialorder %v718_v32, 8.507059e+37  ;;  %v707_v14 = vsel %vm1086_vm10, %v706_v53, %v702_v62 }
 0x15b   : > { %v864_v33 = vpop.eup %863  ;;  %v650_v34 = vsel %vm556_vm2, %v648_v26, %v649_v27 }
 0x15c   : > { %v866_v38 = vpop.eup %865  ;;  %v668_v39 = vsel %vm595_vm3, %v666_v30, %v667_v31  ;;  %v674_v40 = vsel %vm595_vm3, %v640_v25, %v650_v34  ;;  %v710_v41 = vmul.f32 %v864_v33, %v1049_v7  ;;  %vm715_vm11 = vweird.f32 %v864_v33 }
 0x15d   : > { %v677_v43 = vsel %vm676_vm4, %v674_v40, %v658_v29  ;;  %v680_v44 = vsel %vm679_vm5, %v658_v29, %v668_v39  ;;  %v605_v45 = vmul.f32 %v866_v38, %v601_v16  ;;  %v609_v47 = vmul.f32 %v866_v38, %v600_v4  ;;  %vm716_vm13 = vmor %vm714_vm12, %vm715_vm11 }
 0x15e   : > { %682 = vst [vmem:[%s1063_s17] sm:$0xff] %v677_v43  ;;  %v711_v36 = vsub.f32 1.0, %v710_v41 }
 0x15f   : > { %684 = vst [vmem:[%s1063_s17 + $0x10] sm:$0xf] %v680_v44  ;;  %v611_v54 = vmul.f32 0.5, %v605_v45  ;;  %v621_v55 = vmul.f32 0.5, %v609_v47 }
 0x160   : > { %v712_v57 = vmul.f32 %v864_v33, %v711_v36 }
 0x161   : > { %v615_v60 = vrot.slane %v611_v54, 6  ;;  %v625_v61 = vrot.slane %v621_v55, 6 }
 0x162   : > { %v713_v0 = vadd.f32 %v864_v33, %v712_v57 }
 0x163   : > { %v619_v48 = vsub.f32 %v574_v56, %v615_v60  ;;  %v629_v63 = vsub.f32 %v588_v58, %v625_v61  ;;  %v631_v2 = vsub.f32 %v590_v59, %v625_v61  ;;  %v633_v3 = vadd.f32 %v615_v60, %v574_v56 }
 0x164   : > { %v717_v4 = vsel %vm716_vm13, %v864_v33, %v713_v0  ;;  %v635_v5 = vadd.f32 %v625_v61, %v588_v58  ;;  %v637_v6 = vadd.f32 %v625_v61, %v590_v59 }
 0x165   : > { %v722_v8 = vsel %vm719_vm14, %v721_v1, %v717_v4  ;;  %v641_v9 = vrot.slane %v619_v48, 3  ;;  %v651_v10 = vrot.slane %v629_v63, 3  ;;  %v652_v50 = vrot.slane %v631_v2, 3 }
 0x166   : > { %v726_v7 = vrot.slane %v722_v8, 4  ;;  %v659_v11 = vrot.slane %v633_v3, 5  ;;  %v669_v12 = vrot.slane %v635_v5, 5  ;;  %v670_v13 = vrot.slane %v637_v6, 5 }
 0x167   : > { %v653_v15 = vsel %vm556_vm2, %v651_v10, %v652_v50 }
 0x168   : > { %v728_v16 = vsel %vm727_vm8, %v707_v14, %v726_v7  ;;  %v671_v17 = vsel %vm595_vm3, %v669_v12, %v670_v13  ;;  %v675_v18 = vsel %vm595_vm3, %v641_v9, %v653_v15 }
 0x169   : > { %730 = vst [vmem:[%s291_s21] sm:$0x77] %v728_v16  ;;  %v678_v19 = vsel %vm676_vm4, %v675_v18, %v659_v11  ;;  %v681_v20 = vsel %vm679_vm5, %v659_v11, %v671_v17 }
 0x16a   : > { %683 = vst [vmem:[%s1063_s17 + $0x8] sm:$0xff] %v678_v19 }
 0x16b   : > { %685 = vst [vmem:[%s1063_s17 + $0x18] sm:$0xf] %v681_v20 }
 0x16c PF: > { %s18_s24 = sadd.s32 1, %s873_s24  }
 0x16d   : > { %p15_p4 = scmp.ge.s32.totalorder %s18_s24, 4  }
 0x16f   :  { %17 = sbr.rel (!%p15_p4) target bundleno = 1 (0x1), region = 86 }

// kernel: rpn_forward.3
= control target key start
LH: loop header
LB: loop body
LE: loop exit
PB: predicated region body
PF: predicated region fallthrough
CT: control target
= control target key end

     0   :  { %s1428_s12 = smov 0   ;;  %s2246_s0 = inlined_call_operand.vmem [shape: f32[2,128,4], index: 0, kind: input, shape index: {}]   ;;  %s2247_s1 = inlined_call_operand.vmem [shape: f32[2,4,128], index: 1, kind: input, shape index: {}]   ;;  %s2248_s2 = inlined_call_operand.vmem [shape: f32[2,1,128], index: 2, kind: input, shape index: {}]   ;;  %s2249_s3 = inlined_call_operand.vmem [shape: f32[2,1,128], index: 3, kind: output, shape index: {}]  }
   0x1 LB: > { %s1287_s13 = sadd.s32 4294967295, %s1391_s12   ;;  %p1291_p0 = scmp.ge.s32.totalorder %s1391_s12, 1  ;;  %s1391_s12 = sphi %s1428_s12, %s13_s12  }
   0x2   : > { %p154_p1 = scmp.lt.s32.totalorder %s1391_s12, 3 }
   0x4   : > { %p155_p2 = pnand %p1291_p0, %p154_p1 }
   0x6   : > { %158 = sbr.rel (%p155_p2) target bundleno = 707 (0x2c3), region = 32 }
   0xb   : > { %p183_p3 = scmp.lt.s32.totalorder %s1287_s13, 1  ;;  %s1401_s24 = smov 2   ;;  %v2250_v7 = vmov 2   ;;  %v1404_v30 = vmov 0   ;;  %v1405_v56 = vmov 3  }
   0xc   : > { %1332 = vset.pattern.permute.xlu1 %v2250_v7  ;;  %1331 = vset.pattern.permute.xlu2 %v2250_v7  ;;  %s1403_s25 = smov 127   ;;  %s2226_s30 = smov 0  }
   0xd   : > { %s2285_s13 = smov (!%p183_p3, %s1287_s13), 1  ;;  %1335 = vset.pattern.permute.xlu0 %v1404_v30 }
   0xe   : > { %s1297_s14 = sshll.u32 %s2285_s13, 7  ;;  %s194_s20 = scalar_lea.vmem %s2248_s2, %s2285_s13 }
   0xf   : > { %s1442_s17 = scalar_lea.vmem %s2246_s0, %s1297_s14  ;;  %s197_s23 = scalar_lea.vmem %s2249_s3, %s2285_s13  ;;  %v1458_v2 = vld [vmem:[%s194_s20] sm:$0x1]  }
  0x10   : > { %v1453_v0 = vld [vmem:[%s1442_s17 + $0x10] sm:$0xff]  ;;  %v1456_v1 = vld [vmem:[%s1442_s17] sm:$0xff]  ;;  %2257 = vst [vmem:[#allocation3_spill] sm:$0xff] %v1458_v2  ;;  %v1470_v4 = vld [vmem:[%s1442_s17 + $0x18] sm:$0xff]  ;;  %s1294_s26 = sshll.u32 %s2285_s13, 2 }
  0x11   : > { %235 = vrot.lane.b32.xlu1 %v1453_v0, %s1401_s24  ;;  %231 = vrot.lane.b32.xlu0 %v1456_v1, %s1401_s24  ;;  %v1465_v3 = vld [vmem:[%s1442_s17 + $0x20] sm:$0xff]  ;;  %v1473_v5 = vld [vmem:[%s1442_s17 + $0x8] sm:$0xff]  ;;  %s191_s29 = scalar_lea.vmem %s2247_s1, %s1294_s26 }
  0x12   : > { %239 = vrot.lane.b32.xlu2 %v1465_v3, %s1401_s24  ;;  %v1476_v6 = vld [vmem:[%s1442_s17 + $0x28] sm:$0xff]  ;;  %v1487_v8 = vld [vmem:[%s1442_s17 + $0x30] sm:$0xff]  ;;  %v1490_v9 = vld [vmem:[%s1442_s17 + $0x38] sm:$0xff] }
  0x13   : > { %v1493_v10 = vld [vmem:[%s1442_s17 + $0x40] sm:$0xff]  ;;  %v1502_v11 = vld [vmem:[%s1442_s17 + $0x48] sm:$0xff]  ;;  %v1505_v12 = vld [vmem:[%s1442_s17 + $0x50] sm:$0xff] }
  0x14   : > { %v1508_v13 = vld [vmem:[%s1442_s17 + $0x58] sm:$0xff]  ;;  %v1517_v14 = vld [vmem:[%s1442_s17 + $0x60] sm:$0xff]  ;;  %v1520_v15 = vld [vmem:[%s1442_s17 + $0x68] sm:$0xff] }
  0x15   : > { %v1523_v16 = vld [vmem:[%s1442_s17 + $0x70] sm:$0xff]  ;;  %v1532_v17 = vld [vmem:[%s1442_s17 + $0x78] sm:$0xff] }
  0x19   : > { %237 = vrot.lane.b32.xlu1 %v1470_v4, %s1401_s24  ;;  %233 = vrot.lane.b32.xlu0 %v1473_v5, %s1401_s24 }
  0x1a   : > { %241 = vrot.lane.b32.xlu2 %v1476_v6, %s1401_s24 }
  0x21   : > { %243 = vrot.lane.b32.xlu0 %v1487_v8, %s1401_s24  ;;  %245 = vrot.lane.b32.xlu1 %v1490_v9, %s1401_s24 }
  0x22   : > { %247 = vrot.lane.b32.xlu2 %v1493_v10, %s1401_s24 }
  0x29   : > { %249 = vrot.lane.b32.xlu0 %v1502_v11, %s1401_s24  ;;  %251 = vrot.lane.b32.xlu1 %v1505_v12, %s1401_s24 }
  0x2a   : > { %253 = vrot.lane.b32.xlu2 %v1508_v13, %s1401_s24 }
  0x31   : > { %255 = vrot.lane.b32.xlu0 %v1517_v14, %s1401_s24  ;;  %257 = vrot.lane.b32.xlu1 %v1520_v15, %s1401_s24 }
  0x32   : > { %259 = vrot.lane.b32.xlu2 %v1523_v16, %s1401_s24 }
  0x39   : > { %261 = vrot.lane.b32.xlu0 %v1532_v17, %s1401_s24  ;;  %392 = vperm.xlu1 %1332, %v1453_v0  }
  0x3a   : > { %384 = vperm.xlu2 %1331, %v1456_v1  }
  0x41   : > { %400 = vperm.xlu1 %1332, %v1465_v3  }
  0x42   : > { %396 = vperm.xlu2 %1331, %v1470_v4  }
  0x49   : > { %412 = vperm.xlu1 %1332, %v1490_v9  }
  0x4a   : > { %404 = vperm.xlu2 %1331, %v1476_v6  }
  0x51   : > { %424 = vperm.xlu1 %1332, %v1505_v12  }
  0x52   : > { %416 = vperm.xlu2 %1331, %v1493_v10  }
  0x59   : > { %436 = vperm.xlu1 %1332, %v1520_v15  }
  0x5a   : > { %428 = vperm.xlu2 %1331, %v1508_v13  }
  0x61   : > { %1333 = vset.pattern.permute.xlu1 %v1404_v30 }
  0x62   : > { %440 = vperm.xlu2 %1331, %v1523_v16  }
  0x6a   : > { %1334 = vset.pattern.permute.xlu2 %v1404_v30 }
  0x6c   : > { %v240_v18 = vpop.permute.xlu2 %239 }
  0x6d   : > { %v1579_v34 = vsub.f32 %v1465_v3, %v240_v18 }
  0x74   : > { %v242_v19 = vpop.permute.xlu2 %241 }
  0x75   : > { %v1558_v24 = vsub.f32 %v1476_v6, %v242_v19  ;;  %v1406_v19 = vmov 1  }
  0x7c   : > { %v248_v29 = vpop.permute.xlu2 %247 }
  0x7d   : > { %v1573_v31 = vsub.f32 %v1493_v10, %v248_v29 }
  0x83   : > { %v236_v20 = vpop.permute.xlu1 %235  ;;  %v232_v21 = vpop.permute.xlu0 %231 }
  0x84   : > { %v1548_v22 = vsub.f32 %v1453_v0, %v236_v20  ;;  %v1551_v23 = vsub.f32 %v1456_v1, %v232_v21  ;;  %v254_v36 = vpop.permute.xlu2 %253 }
  0x85   : > { %v1588_v37 = vsub.f32 %v1508_v13, %v254_v36 }
  0x86   : > { %315 = vrot.lane.b32.xlu0 %v1548_v22, %s1403_s25  ;;  %311 = vrot.lane.b32.xlu1 %v1551_v23, %s1403_s25 }
  0x8b   : > { %v238_v25 = vpop.permute.xlu1 %237  ;;  %v234_v26 = vpop.permute.xlu0 %233 }
  0x8c   : > { %v1561_v27 = vsub.f32 %v1470_v4, %v238_v25  ;;  %v1564_v28 = vsub.f32 %v1473_v5, %v234_v26  ;;  %v260_v42 = vpop.permute.xlu2 %259 }
  0x8d   : > { %v1603_v43 = vsub.f32 %v1523_v16, %v260_v42 }
  0x8e   : > { %321 = vrot.lane.b32.xlu0 %v1558_v24, %s1403_s25  ;;  %317 = vrot.lane.b32.xlu1 %v1561_v27, %s1403_s25 }
  0x8f   : > { %313 = vrot.lane.b32.xlu2 %v1564_v28, %s1403_s25  ;;  %2258 = vst [vmem:[#allocation4_spill] sm:$0xff] %v1603_v43 }
  0x93   : > { %v244_v32 = vpop.permute.xlu0 %243  ;;  %v246_v35 = vpop.permute.xlu1 %245 }
  0x94   : > { %v1576_v33 = vsub.f32 %v1487_v8, %v244_v32  ;;  %v1591_v38 = vsub.f32 %v1490_v9, %v246_v35  ;;  %v1626_v51 = vpop.permute.xlu2 %384 }
  0x96   : > { %327 = vrot.lane.b32.xlu0 %v1573_v31, %s1403_s25  ;;  %323 = vrot.lane.b32.xlu1 %v1576_v33, %s1403_s25 }
  0x97   : > { %319 = vrot.lane.b32.xlu2 %v1579_v34, %s1403_s25 }
  0x9b   : > { %v250_v39 = vpop.permute.xlu0 %249  ;;  %v252_v41 = vpop.permute.xlu1 %251 }
  0x9c   : > { %v1594_v40 = vsub.f32 %v1502_v11, %v250_v39  ;;  %v1606_v44 = vsub.f32 %v1505_v12, %v252_v41  ;;  %v1633_v52 = vpop.permute.xlu2 %396  ;;  %v1709_v39 = vld [vmem:[%s191_s29] sm:$0xf] }
  0x9d   : > { %2260 = vst [vmem:[#allocation6_spill] sm:$0xff] %v1709_v39  ;;  %v1713_v41 = vperm.slane %v1709_v39, 0 }
  0x9e   : > { %333 = vrot.lane.b32.xlu0 %v1588_v37, %s1403_s25  ;;  %329 = vrot.lane.b32.xlu1 %v1594_v40, %s1403_s25 }
  0x9f   : > { %325 = vrot.lane.b32.xlu2 %v1591_v38, %s1403_s25 }
  0xa3   : > { %v256_v45 = vpop.permute.xlu0 %255  ;;  %v258_v47 = vpop.permute.xlu1 %257 }
  0xa4   : > { %v1609_v46 = vsub.f32 %v1517_v14, %v256_v45  ;;  %v1618_v48 = vsub.f32 %v1520_v15, %v258_v47  ;;  %v1638_v53 = vpop.permute.xlu2 %404 }
  0xa6   : > { %339 = vrot.lane.b32.xlu0 %v1603_v43, %s1403_s25  ;;  %335 = vrot.lane.b32.xlu1 %v1609_v46, %s1403_s25 }
  0xa7   : > { %331 = vrot.lane.b32.xlu2 %v1606_v44, %s1403_s25 }
  0xab   : > { %v262_v49 = vpop.permute.xlu0 %261  ;;  %v1643_v54 = vpop.permute.xlu1 %392 }
  0xac   : > { %v1621_v50 = vsub.f32 %v1532_v17, %v262_v49  ;;  %v1645_v55 = vpop.permute.xlu2 %416 }
  0xae   : > { %2259 = vst [vmem:[#allocation5_spill] sm:$0xff] %v1621_v50  ;;  %473 = vperm.xlu0 %1335, %v1453_v0   ;;  %341 = vrot.lane.b32.xlu1 %v1621_v50, %s1403_s25 }
  0xaf   : > { %337 = vrot.lane.b32.xlu2 %v1618_v48, %s1403_s25 }
  0xb3   : > { %v1650_v57 = vpop.permute.xlu1 %400 }
  0xb4   : > { %v1653_v58 = vpop.permute.xlu2 %428 }
  0xb6   : > { %493 = vperm.xlu0 %1335, %v1490_v9   ;;  %465 = vperm.xlu1 %1333, %v1456_v1  }
  0xb7   : > { %469 = vperm.xlu2 %1334, %v1473_v5  }
  0xbb   : > { %v1657_v59 = vpop.permute.xlu1 %412 }
  0xbc   : > { %v1662_v60 = vpop.permute.xlu2 %440 }
  0xbe   : > { %505 = vperm.xlu0 %1335, %v1505_v12   ;;  %477 = vperm.xlu1 %1333, %v1470_v4  }
  0xbf   : > { %481 = vperm.xlu2 %1334, %v1465_v3  }
  0xc3   : > { %v1664_v61 = vpop.permute.xlu1 %424 }
  0xc6   : > { %517 = vperm.xlu0 %1335, %v1520_v15   ;;  %485 = vperm.xlu1 %1333, %v1476_v6  }
  0xc7   : > { %489 = vperm.xlu2 %1334, %v1487_v8  }
  0xcb   : > { %v1672_v63 = vpop.permute.xlu1 %436 }
  0xce   : > { %1336 = vset.pattern.permute.xlu0 %v1405_v56  ;;  %497 = vperm.xlu1 %1333, %v1493_v10  }
  0xcf   : > { %501 = vperm.xlu2 %1334, %v1502_v11   ;;  %578 = vperm.xlu0 %1336, %v1456_v1  }
  0xd6   : > { %509 = vperm.xlu1 %1333, %v1508_v13  }
  0xd7   : > { %513 = vperm.xlu2 %1334, %v1517_v14   ;;  %598 = vperm.xlu0 %1336, %v1476_v6  }
  0xde   : > { %521 = vperm.xlu1 %1333, %v1523_v16  }
  0xdf   : > { %525 = vperm.xlu2 %1334, %v1532_v17   ;;  %610 = vperm.xlu0 %1336, %v1493_v10  }
  0xe6   : > { %1337 = vset.pattern.permute.xlu1 %v1405_v56 }
  0xe7   : > { %1338 = vset.pattern.permute.xlu2 %v1405_v56  ;;  %622 = vperm.xlu0 %1336, %v1508_v13   ;;  %v1726_v56 = vperm.slane %v1709_v39, 2  ;;  %v2263_v39 = vmov 2  }
  0xe8   : > { %586 = vperm.xlu2 %1338, %v1453_v0   ;;  %582 = vperm.xlu1 %1337, %v1473_v5  }
  0xe9   : > { %v1669_v62 = vpop.permute.xlu2 %313 }
  0xef   : > { %634 = vperm.xlu0 %1336, %v1523_v16  }
  0xf0   : > { %594 = vperm.xlu2 %1338, %v1465_v3   ;;  %590 = vperm.xlu1 %1337, %v1470_v4  }
  0xf1   : > { %v1676_v18 = vpop.permute.xlu2 %319 }
  0xf7   : > { %1340 = vset.pattern.permute.xlu0 %v1406_v19 }
  0xf8   : > { %606 = vperm.xlu2 %1338, %v1490_v9   ;;  %602 = vperm.xlu1 %1337, %v1487_v8   ;;  %v1680_v20 = vpop.permute.xlu1 %311  ;;  %v1682_v21 = vpop.permute.xlu0 %315 }
  0xf9   : > { %663 = vperm.xlu0 %1340, %v1473_v5   ;;  %v1685_v25 = vpop.permute.xlu2 %325 }
 0x100   : > { %618 = vperm.xlu2 %1338, %v1505_v12   ;;  %614 = vperm.xlu1 %1337, %v1502_v11   ;;  %v1689_v26 = vpop.permute.xlu1 %317  ;;  %v1691_v29 = vpop.permute.xlu0 %321 }
 0x101   : > { %683 = vperm.xlu0 %1340, %v1487_v8   ;;  %v1694_v30 = vpop.permute.xlu2 %331 }
 0x108   : > { %630 = vperm.xlu2 %1338, %v1520_v15   ;;  %626 = vperm.xlu1 %1337, %v1517_v14   ;;  %v1698_v32 = vpop.permute.xlu1 %323  ;;  %v1700_v35 = vpop.permute.xlu0 %327 }
 0x109   : > { %695 = vperm.xlu0 %1340, %v1502_v11   ;;  %v1704_v36 = vpop.permute.xlu2 %337 }
 0x110   : > { %1339 = vset.pattern.permute.xlu2 %v1406_v19  ;;  %638 = vperm.xlu1 %1337, %v1532_v17   ;;  %v1715_v42 = vpop.permute.xlu1 %329  ;;  %v1717_v45 = vpop.permute.xlu0 %333 }
 0x111   : > { %707 = vperm.xlu0 %1340, %v1517_v14   ;;  %659 = vperm.xlu2 %1339, %v1456_v1   ;;  %v1721_v47 = vpop.permute.xlu2 %469  ;;  %v452_v1 = vmin.f32 %v1650_v57, %v1726_v56 }
 0x112   : > { %2261 = vst [vmem:[#allocation7_spill] sm:$0xff] %v1721_v47 }
 0x118   : > { %1341 = vset.pattern.permute.xlu1 %v1406_v19  ;;  %v1728_v7 = vpop.permute.xlu1 %335  ;;  %v1730_v2 = vpop.permute.xlu0 %339 }
 0x119   : > { %2262 = vst [vmem:[#allocation8_spill] sm:$0xff] %v1730_v2  ;;  %719 = vperm.xlu0 %1340, %v1532_v17   ;;  %671 = vperm.xlu2 %1339, %v1470_v4   ;;  %v482_v50 = vpop.permute.xlu2 %481  ;;  %v450_v2 = vmin.f32 %v1643_v54, %v1726_v56  ;;  %v448_v54 = vmin.f32 %v1626_v51, %v1726_v56 }
 0x11a   : > { %v533_v43 = vmax.f32 %v482_v50, %v1713_v41  ;;  %667 = vperm.xlu1 %1341, %v1453_v0  }
 0x11c   : > { %v1738_v49 = vsub.f32 %v452_v1, %v533_v43 }
 0x120   : > { %v1740_v47 = vpop.permute.xlu1 %341  ;;  %v474_v19 = vpop.permute.xlu0 %473 }
 0x121   : > { %1342 = vset.pattern.permute.xlu0 %v2263_v39  ;;  %679 = vperm.xlu2 %1339, %v1476_v6   ;;  %v1746_v4 = vpop.permute.xlu2 %489  ;;  %v531_v57 = vmax.f32 %v474_v19, %v1713_v41  ;;  %v455_v6 = vmin.f32 %v1657_v59, %v1726_v56 }
 0x122   : > { %675 = vperm.xlu1 %1341, %v1465_v3   ;;  %388 = vperm.xlu0 %1342, %v1473_v5  }
 0x123   : > { %v1753_v0 = vsub.f32 %v450_v2, %v531_v57 }
 0x128   : > { %v466_v43 = vpop.permute.xlu1 %465  ;;  %v494_v1 = vpop.permute.xlu0 %493 }
 0x129   : > { %691 = vperm.xlu2 %1339, %v1493_v10   ;;  %v1760_v19 = vpop.permute.xlu2 %501  ;;  %v529_v50 = vmax.f32 %v466_v43, %v1713_v41  ;;  %v536_v3 = vmax.f32 %v494_v1, %v1713_v41  ;;  %v451_v10 = vmin.f32 %v1633_v52, %v1726_v56  ;;  %v458_v43 = vmin.f32 %v1664_v61, %v1726_v56 }
 0x12a   : > { %v538_v2 = vmax.f32 %v1760_v19, %v1713_v41  ;;  %687 = vperm.xlu1 %1341, %v1490_v9   ;;  %408 = vperm.xlu0 %1342, %v1487_v8  }
 0x12b   : > { %v1768_v5 = vsub.f32 %v448_v54, %v529_v50  ;;  %v1770_v51 = vsub.f32 %v455_v6, %v536_v3  ;;  %v461_v3 = vmin.f32 %v1672_v63, %v1726_v56 }
 0x130   : > { %v478_v59 = vpop.permute.xlu1 %477  ;;  %v506_v57 = vpop.permute.xlu0 %505 }
 0x131   : > { %703 = vperm.xlu2 %1339, %v1508_v13   ;;  %v1777_v1 = vpop.permute.xlu2 %513  ;;  %v532_v9 = vmax.f32 %v478_v59, %v1713_v41  ;;  %v539_v8 = vmax.f32 %v506_v57, %v1713_v41  ;;  %v453_v13 = vmin.f32 %v1638_v53, %v1726_v56 }
 0x132   : > { %v541_v50 = vmax.f32 %v1777_v1, %v1713_v41  ;;  %699 = vperm.xlu1 %1341, %v1505_v12   ;;  %420 = vperm.xlu0 %1342, %v1502_v11  }
 0x133   : > { %v1785_v54 = vsub.f32 %v451_v10, %v532_v9  ;;  %v1787_v52 = vsub.f32 %v458_v43, %v539_v8  ;;  %v360_v43 = vmul.f32 %v1669_v62, %v1564_v28  ;;  %v359_v9 = vmul.f32 %v1680_v20, %v1551_v23 }
 0x134   : > { %v361_v28 = vmul.f32 %v1682_v21, %v1548_v22  ;;  %v459_v23 = vmin.f32 %v1653_v58, %v1726_v56  ;;  %v363_v62 = vmul.f32 %v1676_v18, %v1579_v34  ;;  %v362_v20 = vmul.f32 %v1689_v26, %v1561_v27 }
 0x135   : > { %v366_v22 = vmul.f32 %v1685_v25, %v1591_v38  ;;  %v462_v34 = vmin.f32 %v1662_v60, %v1726_v56  ;;  %v364_v27 = vmul.f32 %v1691_v29, %v1558_v24  ;;  %v365_v18 = vmul.f32 %v1698_v32, %v1576_v33 }
 0x136   : > { %v369_v38 = vmul.f32 %v1694_v30, %v1606_v44  ;;  %v367_v24 = vmul.f32 %v1700_v35, %v1573_v31  ;;  %v368_v33 = vmul.f32 %v1715_v42, %v1594_v40  ;;  %v372_v32 = vmul.f32 %v1704_v36, %v1618_v48  ;;  %v2264_v42 = vld [vmem:[#allocation6_spill] sm:$0xff]  ;;  %v2265_v48 = vld [vmem:[#allocation4_spill] sm:$0xff] }
 0x137   : > { %v370_v44 = vmul.f32 %v1717_v45, %v1588_v37  ;;  %v371_v31 = vmul.f32 %v1728_v7, %v1609_v46  ;;  %v2266_v36 = vld [vmem:[#allocation8_spill] sm:$0xff]  ;;  %v2267_v45 = vld [vmem:[#allocation5_spill] sm:$0xff] }
 0x138   : > { %v486_v61 = vpop.permute.xlu1 %485  ;;  %v518_v6 = vpop.permute.xlu0 %517  ;;  %v373_v37 = vmul.f32 %v2266_v36, %v2265_v48  ;;  %v374_v7 = vmul.f32 %v1740_v47, %v2267_v45 }
 0x139   : > { %715 = vperm.xlu2 %1339, %v1523_v16   ;;  %v1794_v59 = vpop.permute.xlu2 %525  ;;  %v534_v12 = vmax.f32 %v486_v61, %v1713_v41  ;;  %v542_v11 = vmax.f32 %v518_v6, %v1713_v41  ;;  %v456_v16 = vmin.f32 %v1645_v55, %v1726_v56 }
 0x13a   : > { %v544_v57 = vmax.f32 %v1794_v59, %v1713_v41  ;;  %711 = vperm.xlu1 %1341, %v1520_v15   ;;  %432 = vperm.xlu0 %1342, %v1517_v14  }
 0x13b   : > { %v1802_v10 = vsub.f32 %v453_v13, %v534_v12  ;;  %v1804_v53 = vsub.f32 %v461_v3, %v542_v11  ;;  %v1873_v11 = vperm.slane %v2264_v42, 3 }
 0x140   : > { %v498_v63 = vpop.permute.xlu1 %497 }
 0x141   : > { %1344 = vset.pattern.permute.xlu2 %v2263_v39  ;;  %v537_v15 = vmax.f32 %v498_v63, %v1713_v41  ;;  %v579_v8 = vpop.permute.xlu0 %578  ;;  %v1876_v63 = vperm.slane %v2264_v42, 1 }
 0x142   : > { %1343 = vset.pattern.permute.xlu1 %v2263_v39  ;;  %444 = vperm.xlu0 %1342, %v1532_v17   ;;  %v1816_v14 = vpop.permute.xlu2 %586 }
 0x143   : > { %v1818_v61 = vsub.f32 %v456_v16, %v537_v15  ;;  %794 = vperm.xlu2 %1344, %v360_v43   ;;  %789 = vperm.xlu1 %1343, %v359_v9   ;;  %v642_v9 = vmin.f32 %v579_v8, %v1873_v11  ;;  %v564_v8 = vmax.f32 %v1785_v54, 0.0 }
 0x148   : > { %v510_v55 = vpop.permute.xlu1 %509 }
 0x149   : > { %v540_v17 = vmax.f32 %v510_v55, %v1713_v41  ;;  %v1829_v39 = vpop.permute.xlu0 %598  ;;  %v561_v55 = vmax.f32 %v1768_v5, 0.0 }
 0x14a   : > { %v1831_v6 = vpop.permute.xlu2 %594  ;;  %799 = vperm.xlu0 %1342, %v361_v28  }
 0x14b   : > { %v1833_v13 = vsub.f32 %v459_v23, %v540_v17  ;;  %809 = vperm.xlu2 %1344, %v363_v62   ;;  %804 = vperm.xlu1 %1343, %v362_v20  }
 0x150   : > { %v522_v58 = vpop.permute.xlu1 %521 }
 0x151   : > { %v543_v21 = vmax.f32 %v522_v58, %v1713_v41  ;;  %v1844_v26 = vpop.permute.xlu0 %610 }
 0x152   : > { %v1846_v3 = vpop.permute.xlu2 %606  ;;  %824 = vperm.xlu0 %1342, %v366_v22  }
 0x153   : > { %v1848_v12 = vsub.f32 %v462_v34, %v543_v21  ;;  %819 = vperm.xlu2 %1344, %v365_v18   ;;  %814 = vperm.xlu1 %1343, %v364_v27  }
 0x159   : > { %v1856_v60 = vpop.permute.xlu0 %622 }
 0x15a   : > { %v1858_v25 = vpop.permute.xlu2 %618  ;;  %v1860_v29 = vpop.permute.xlu1 %582  ;;  %839 = vperm.xlu0 %1342, %v369_v38  }
 0x15b   : > { %834 = vperm.xlu2 %1344, %v368_v33   ;;  %829 = vperm.xlu1 %1343, %v367_v24   ;;  %v647_v24 = vmin.f32 %v1829_v39, %v1873_v11  ;;  %v569_v39 = vmax.f32 %v1818_v61, 0.0 }
 0x161   : > { %v1868_v30 = vpop.permute.xlu0 %634 }
 0x162   : > { %v1870_v40 = vpop.permute.xlu2 %630  ;;  %v591_v35 = vpop.permute.xlu1 %590  ;;  %854 = vperm.xlu0 %1342, %v372_v32  }
 0x163   : > { %849 = vperm.xlu2 %1344, %v371_v31   ;;  %844 = vperm.xlu1 %1343, %v370_v44   ;;  %v645_v22 = vmin.f32 %v591_v35, %v1873_v11  ;;  %v566_v44 = vmax.f32 %v1802_v10, 0.0 }
 0x16a   : > { %v1882_v46 = vpop.permute.xlu1 %602 }
 0x16b   : > { %864 = vperm.xlu2 %1344, %v374_v7   ;;  %859 = vperm.xlu1 %1343, %v373_v37   ;;  %v660_v16 = vpop.permute.xlu2 %659  ;;  %v1884_v43 = vpop.permute.xlu0 %663  ;;  %v650_v37 = vmin.f32 %v1844_v26, %v1873_v11  ;;  %v644_v26 = vmin.f32 %v1816_v14, %v1873_v11  ;;  %v656_v14 = vmin.f32 %v1868_v30, %v1873_v11 }
 0x16c   : > { %v723_v15 = vmax.f32 %v660_v16, %v1876_v63 }
 0x16e   : > { %v739_v28 = vsub.f32 %v642_v9, %v723_v15  ;;  %v376_v9 = vrot.slane %v2264_v42, 6 }
 0x170   : > { %v755_v23 = vmax.f32 %v739_v28, 0.0 }
 0x172   : > { %v1889_v62 = vpop.permute.xlu1 %614  ;;  %v1891_v20 = vmul.f32 %v755_v23, %v561_v55  ;;  %v653_v55 = vmin.f32 %v1856_v60, %v1873_v11 }
 0x173   : > { %v672_v47 = vpop.permute.xlu2 %671  ;;  %v1893_v17 = vpop.permute.xlu0 %683 }
 0x174   : > { %v726_v58 = vmax.f32 %v672_v47, %v1876_v63 }
 0x176   : > { %v742_v34 = vsub.f32 %v645_v22, %v726_v58  ;;  %v378_v58 = vsub.f32 %v2264_v42, %v376_v9  ;;  %v2268_v9 = vld [vmem:[#allocation7_spill] sm:$0xff] }
 0x178   : > { %v758_v27 = vmax.f32 %v742_v34, 0.0 }
 0x17a   : > { %v1898_v18 = vpop.permute.xlu1 %626  ;;  %v1900_v21 = vmul.f32 %v758_v27, %v564_v8  ;;  %v572_v8 = vmax.f32 %v1833_v13, 0.0 }
 0x17b   : > { %v680_v5 = vpop.permute.xlu2 %679  ;;  %v1902_v38 = vpop.permute.xlu0 %695 }
 0x17c   : > { %v728_v33 = vmax.f32 %v680_v5, %v1876_v63  ;;  %v563_v5 = vmax.f32 %v1753_v0, 0.0  ;;  %v646_v0 = vmin.f32 %v1831_v6, %v1873_v11  ;;  %v565_v6 = vmax.f32 %v1738_v49, 0.0 }
 0x17e   : > { %v744_v32 = vsub.f32 %v647_v24, %v728_v33  ;;  %v380_v33 = vrot.slane %v378_v58, 1 }
 0x180   : > { %v760_v31 = vmax.f32 %v744_v32, 0.0 }
 0x182   : > { %v1908_v35 = vpop.permute.xlu1 %638  ;;  %v1910_v54 = vmul.f32 %v760_v31, %v566_v44  ;;  %v724_v31 = vmax.f32 %v1884_v43, %v1876_v63  ;;  %v2269_v43 = vmax.f32 %v2268_v9, %v1713_v41 }
 0x183   : > { %v692_v48 = vpop.permute.xlu2 %691  ;;  %v1912_v36 = vpop.permute.xlu0 %707 }
 0x184   : > { %v731_v45 = vmax.f32 %v692_v48, %v1876_v63 }
 0x186   : > { %v747_v7 = vsub.f32 %v650_v37, %v731_v45 }
 0x188   : > { %v763_v16 = vmax.f32 %v747_v7, 0.0  ;;  %v643_v7 = vmin.f32 %v1860_v29, %v1873_v11 }
 0x18a   : > { %v1919_v10 = vmul.f32 %v763_v16, %v569_v39  ;;  %v382_v16 = vmul.f32 %v380_v33, %v378_v58 }
 0x18b   : > { %v704_v15 = vpop.permute.xlu2 %703  ;;  %v1921_v28 = vpop.permute.xlu0 %719 }
 0x18c   : > { %v734_v23 = vmax.f32 %v704_v15, %v1876_v63  ;;  %v668_v47 = vpop.permute.xlu1 %667 }
 0x18d   : > { %v725_v22 = vmax.f32 %v668_v47, %v1876_v63 }
 0x18e   : > { %v750_v61 = vsub.f32 %v653_v55, %v734_v23  ;;  %v575_v55 = vmax.f32 %v1848_v12, 0.0  ;;  %v740_v23 = vsub.f32 %v643_v7, %v724_v31  ;;  %v568_v31 = vmax.f32 %v1770_v51, 0.0 }
 0x18f   : > { %v741_v34 = vsub.f32 %v644_v26, %v725_v22  ;;  %v652_v7 = vmin.f32 %v1858_v25, %v1873_v11  ;;  %v648_v51 = vmin.f32 %v1882_v46, %v1873_v11 }
 0x190   : > { %v766_v27 = vmax.f32 %v750_v61, 0.0  ;;  %v1952_v61 = vperm.slane %v382_v16, 2  ;;  %v756_v58 = vmax.f32 %v740_v23, 0.0  ;;  %v571_v23 = vmax.f32 %v1787_v52, 0.0 }
 0x191   : > { %v757_v24 = vmax.f32 %v741_v34, 0.0 }
 0x192   : > { %v1932_v60 = vmul.f32 %v766_v27, %v572_v8 }
 0x193   : > { %v716_v32 = vpop.permute.xlu2 %715  ;;  %v1934_v44 = vmul.f32 %v757_v24, %v563_v5  ;;  %v649_v5 = vmin.f32 %v1846_v3, %v1873_v11  ;;  %v729_v3 = vmax.f32 %v1893_v17, %v1876_v63 }
 0x194   : > { %v737_v42 = vmax.f32 %v716_v32, %v1876_v63  ;;  %v676_v48 = vpop.permute.xlu1 %675  ;;  %v389_v13 = vpop.permute.xlu0 %388 }
 0x195   : > { %v727_v37 = vmax.f32 %v676_v48, %v1876_v63  ;;  %v449_v45 = vmin.f32 %v389_v13, %v1726_v56  ;;  %v745_v17 = vsub.f32 %v648_v51, %v729_v3 }
 0x196   : > { %v753_v39 = vsub.f32 %v656_v14, %v737_v42 }
 0x197   : > { %v743_v30 = vsub.f32 %v646_v0, %v727_v37  ;;  %v546_v15 = vsub.f32 %v449_v45, %v2269_v43 }
 0x198   : > { %v769_v47 = vmax.f32 %v753_v39, 0.0 }
 0x199   : > { %v759_v26 = vmax.f32 %v743_v30, 0.0  ;;  %v562_v22 = vmax.f32 %v546_v15, 0.0  ;;  %v2270_v30 = vmax.f32 %v1746_v4, %v1713_v41 }
 0x19a   : > { %v1954_v34 = vmul.f32 %v769_v47, %v575_v55 }
 0x19b   : > { %v1956_v29 = vmul.f32 %v759_v26, %v565_v6  ;;  %v1961_v33 = vmul.f32 %v756_v58, %v562_v22  ;;  %v732_v26 = vmax.f32 %v1902_v38, %v1876_v63 }
 0x19c   : > { %v688_v8 = vpop.permute.xlu1 %687  ;;  %v409_v27 = vpop.permute.xlu0 %408 }
 0x19d   : > { %v730_v12 = vmax.f32 %v688_v8, %v1876_v63  ;;  %v795_v24 = vpop.permute.xlu2 %794  ;;  %v454_v13 = vmin.f32 %v409_v27, %v1726_v56  ;;  %v651_v8 = vmin.f32 %v1889_v62, %v1873_v11  ;;  %v761_v27 = vmax.f32 %v745_v17, 0.0 }
 0x19e   : > { %v869_v49 = vadd.f32 %v1952_v61, %v795_v24  ;;  %v654_v17 = vmin.f32 %v1898_v18, %v1873_v11 }
 0x19f   : > { %v746_v32 = vsub.f32 %v649_v5, %v730_v12  ;;  %v551_v9 = vsub.f32 %v454_v13, %v2270_v30  ;;  %v655_v12 = vmin.f32 %v1870_v40, %v1873_v11 }
 0x1a0   : > { %v885_v14 = vsub.f32 %v869_v49, %v1961_v33 }
 0x1a1   : > { %v762_v42 = vmax.f32 %v746_v32, 0.0  ;;  %v567_v46 = vmax.f32 %v551_v9, 0.0 }
 0x1a2   : > { %v901_v48 = vmax.f32 %v885_v14, 1e-08  ;;  %v748_v14 = vsub.f32 %v651_v8, %v732_v26 }
 0x1a3   : > { %v1967_v0 = vmul.f32 %v762_v42, %v568_v31  ;;  %v1998_v42 = vmul.f32 %v761_v27, %v567_v46 }
 0x1a4   : > { %1345 = vrcp.f32 %v901_v48  ;;  %v700_v37 = vpop.permute.xlu1 %699  ;;  %v421_v45 = vpop.permute.xlu0 %420  ;;  %v942_v31 = vand.u32 2147483648, %v901_v48  ;;  %v940_v3 = vand.u32 2147483647, %v901_v48  ;;  %vm936_vm1 = vweird.f32 %v901_v48 }
 0x1a5   : > { %v733_v39 = vmax.f32 %v700_v37, %v1876_v63  ;;  %v810_v16 = vpop.permute.xlu2 %809  ;;  %v457_v25 = vmin.f32 %v421_v45, %v1726_v56  ;;  %v574_v45 = vmax.f32 %v1804_v53, 0.0  ;;  %v764_v9 = vmax.f32 %v748_v14, 0.0 }
 0x1a6   : > { %v872_v43 = vadd.f32 %v1952_v61, %v810_v16  ;;  %vm941_vm3 = vcmp.eq.f32.partialorder %v940_v3, 8.507059e+37  ;;  %v735_v53 = vmax.f32 %v1912_v36, %v1876_v63 }
 0x1a7   : > { %v749_v15 = vsub.f32 %v652_v7, %v733_v39  ;;  %v554_v38 = vsub.f32 %v457_v25, %v538_v2  ;;  %v943_v39 = vor.u32 1.1754944e-38, %v942_v31 }
 0x1a8   : > { %v888_v55 = vsub.f32 %v872_v43, %v1956_v29 }
 0x1a9   : > { %v765_v47 = vmax.f32 %v749_v15, 0.0  ;;  %v570_v19 = vmax.f32 %v554_v38, 0.0 }
 0x1aa   : > { %v1346_v6 = vpop.eup %1345  ;;  %v1985_v22 = vmax.f32 %v888_v55, 1e-08 }
 0x1ab   : > { %v932_v4 = vmul.f32 %v1346_v6, %v901_v48  ;;  %v1987_v58 = vmul.f32 %v765_v47, %v571_v23  ;;  %vm937_vm0 = vweird.f32 %v1346_v6 }
 0x1ac   : > { %1347 = vrcp.f32 %v1985_v22  ;;  %v712_v52 = vpop.permute.xlu1 %711  ;;  %v433_v5 = vpop.permute.xlu0 %432  ;;  %vm938_vm2 = vmor %vm936_vm1, %vm937_vm0  ;;  %v987_v25 = vand.u32 2147483648, %v1985_v22  ;;  %vm981_vm5 = vweird.f32 %v1985_v22 }
 0x1ad   : > { %v933_v24 = vsub.f32 1.0, %v932_v4  ;;  %v736_v49 = vmax.f32 %v712_v52, %v1876_v63  ;;  %v820_v32 = vpop.permute.xlu2 %819  ;;  %v460_v30 = vmin.f32 %v433_v5, %v1726_v56  ;;  %v751_v52 = vsub.f32 %v654_v17, %v735_v53 }
 0x1ae   : > { %v874_v62 = vadd.f32 %v1952_v61, %v820_v32  ;;  %v738_v5 = vmax.f32 %v1921_v28, %v1876_v63  ;;  %v988_v38 = vor.u32 1.1754944e-38, %v987_v25 }
 0x1af   : > { %v934_v13 = vmul.f32 %v1346_v6, %v933_v24  ;;  %v752_v37 = vsub.f32 %v655_v12, %v736_v49  ;;  %v557_v18 = vsub.f32 %v460_v30, %v541_v50  ;;  %v657_v50 = vmin.f32 %v1908_v35, %v1873_v11 }
 0x1b0   : > { %v890_v40 = vsub.f32 %v874_v62, %v1998_v42 }
 0x1b1   : > { %v935_v7 = vadd.f32 %v1346_v6, %v934_v13  ;;  %v768_v16 = vmax.f32 %v752_v37, 0.0  ;;  %v573_v32 = vmax.f32 %v557_v18, 0.0  ;;  %v767_v13 = vmax.f32 %v751_v52, 0.0 }
 0x1b2   : > { %v1348_v2 = vpop.eup %1347  ;;  %v2003_v51 = vmax.f32 %v890_v40, 1e-08  ;;  %v754_v3 = vsub.f32 %v657_v50, %v738_v5 }
 0x1b3   : > { %v939_v43 = vsel %vm938_vm2, %v1346_v6, %v935_v7  ;;  %v977_v15 = vmul.f32 %v1348_v2, %v1985_v22  ;;  %v2014_v6 = vmul.f32 %v764_v9, %v570_v19  ;;  %v2021_v8 = vmul.f32 %v768_v16, %v574_v45 }
 0x1b4   : > { %v944_v48 = vsel %vm941_vm3, %v943_v39, %v939_v43  ;;  %1349 = vrcp.f32 %v2003_v51  ;;  %v445_v55 = vpop.permute.xlu0 %444  ;;  %vm982_vm4 = vweird.f32 %v1348_v2  ;;  %v1015_v40 = vand.u32 2147483647, %v2003_v51 }
 0x1b5   : > { %v945_v23 = vmul.f32 %v944_v48, %v1961_v33  ;;  %v978_v47 = vsub.f32 1.0, %v977_v15  ;;  %v835_v26 = vpop.permute.xlu2 %834  ;;  %v790_v46 = vpop.permute.xlu1 %789  ;;  %v985_v33 = vand.u32 2147483647, %v1985_v22  ;;  %vm983_vm6 = vmor %vm981_vm5, %vm982_vm4  ;;  %v463_v63 = vmin.f32 %v445_v55, %v1726_v56 }
 0x1b6   : > { %v877_v4 = vadd.f32 %v1952_v61, %v835_v26  ;;  %v868_v36 = vadd.f32 %v1952_v61, %v790_v46  ;;  %v1017_v56 = vand.u32 2147483648, %v2003_v51  ;;  %v770_v30 = vmax.f32 %v754_v3, 0.0 }
 0x1b7   : > { %1157 = vst [vmem:[#allocation2 + $0x8] sm:$0xff] %v945_v23  ;;  %v979_v27 = vmul.f32 %v1348_v2, %v978_v47  ;;  %vm986_vm7 = vcmp.eq.f32.partialorder %v985_v33, 8.507059e+37  ;;  %v560_v19 = vsub.f32 %v463_v63, %v544_v57  ;;  %vm1011_vm9 = vweird.f32 %v2003_v51 }
 0x1b8   : > { %v893_v12 = vsub.f32 %v877_v4, %v2014_v6  ;;  %v884_v1 = vsub.f32 %v868_v36, %v1891_v20  ;;  %vm1016_vm10 = vcmp.eq.f32.partialorder %v1015_v40, 8.507059e+37  ;;  %v1018_v57 = vor.u32 1.1754944e-38, %v1017_v56 }
 0x1b9   : > { %v980_v24 = vadd.f32 %v1348_v2, %v979_v27  ;;  %v576_v48 = vmax.f32 %v560_v19, 0.0 }
 0x1ba   : > { %v1350_v49 = vpop.eup %1349  ;;  %v2031_v14 = vmax.f32 %v893_v12, 1e-08  ;;  %v2033_v31 = vmax.f32 %v884_v1, 1e-08 }
 0x1bb   : > { %v984_v28 = vsel %vm983_vm6, %v1348_v2, %v980_v24  ;;  %v1007_v62 = vmul.f32 %v1350_v49, %v2003_v51  ;;  %v2045_v2 = vmul.f32 %v767_v13, %v573_v32  ;;  %vm1012_vm8 = vweird.f32 %v1350_v49 }
 0x1bc   : > { %v989_v11 = vsel %vm986_vm7, %v988_v38, %v984_v28  ;;  %1351 = vrcp.f32 %v2031_v14  ;;  %v800_v35 = vpop.permute.xlu0 %799  ;;  %vm1013_vm11 = vmor %vm1011_vm9, %vm1012_vm8  ;;  %v1060_v17 = vand.u32 2147483647, %v2031_v14  ;;  %v1062_v53 = vand.u32 2147483648, %v2031_v14 }
 0x1bd   : > { %v990_v22 = vmul.f32 %v989_v11, %v1956_v29  ;;  %v1008_v37 = vsub.f32 1.0, %v1007_v62  ;;  %1353 = vrcp.f32 %v2033_v31  ;;  %v850_v45 = vpop.permute.xlu2 %849  ;;  %v805_v7 = vpop.permute.xlu1 %804  ;;  %v870_v9 = vadd.f32 %v1952_v61, %v800_v35 }
 0x1be   : > { %v880_v29 = vadd.f32 %v1952_v61, %v850_v45  ;;  %v871_v16 = vadd.f32 %v1952_v61, %v805_v7  ;;  %v925_v47 = vand.u32 2147483647, %v2033_v31  ;;  %v927_v33 = vand.u32 2147483648, %v2033_v31 }
 0x1bf   : > { %1160 = vst [vmem:[#allocation2 + $0x20] sm:$0xff] %v990_v22  ;;  %v1009_v39 = vmul.f32 %v1350_v49, %v1008_v37  ;;  %v886_v4 = vsub.f32 %v870_v9, %v1934_v44  ;;  %vm1056_vm12 = vweird.f32 %v2031_v14  ;;  %v2068_v1 = vmul.f32 %v770_v30, %v576_v48 }
 0x1c0   : > { %v896_v15 = vsub.f32 %v880_v29, %v2045_v2  ;;  %v887_v41 = vsub.f32 %v871_v16, %v1900_v21  ;;  %vm2070_vm14 = vcmp.eq.f32.partialorder %v1060_v17, 8.507059e+37  ;;  %vm921_vm15 = vweird.f32 %v2033_v31 }
 0x1c1   : > { %v1010_v43 = vadd.f32 %v1350_v49, %v1009_v39  ;;  %vm2077_vm1 = vcmp.eq.f32.partialorder %v925_v47, 8.507059e+37  ;;  %v928_v28 = vor.u32 1.1754944e-38, %v927_v33 }
 0x1c2   : > { %v1352_v59 = vpop.eup %1351  ;;  %v2057_v25 = vmax.f32 %v896_v15, 1e-08  ;;  %v2060_v18 = vmax.f32 %v887_v41, 1e-08 }
 0x1c3   : > { %v1354_v55 = vpop.eup %1353  ;;  %v1014_v23 = vsel %vm1013_vm11, %v1350_v49, %v1010_v43  ;;  %v1052_v51 = vmul.f32 %v1352_v59, %v2031_v14  ;;  %vm1057_vm13 = vweird.f32 %v1352_v59  ;;  %v2075_v49 = vmax.f32 %v886_v4, 1e-08 }
 0x1c4   : > { %v1019_v26 = vsel %vm1016_vm10, %v1018_v57, %v1014_v23  ;;  %v917_v46 = vmul.f32 %v1354_v55, %v2033_v31  ;;  %1355 = vrcp.f32 %v2057_v25  ;;  %vm922_vm0 = vweird.f32 %v1354_v55  ;;  %v825_v13 = vpop.permute.xlu0 %824  ;;  %vm1058_vm2 = vmor %vm1056_vm12, %vm1057_vm13 }
 0x1c5   : > { %v1020_v36 = vmul.f32 %v1019_v26, %v1998_v42  ;;  %v1053_v27 = vsub.f32 1.0, %v1052_v51  ;;  %v815_v52 = vpop.permute.xlu1 %814  ;;  %1357 = vrcp.f32 %v2060_v18  ;;  %v865_v12 = vpop.permute.xlu2 %864  ;;  %v1063_v42 = vor.u32 1.1754944e-38, %v1062_v53  ;;  %vm923_vm4 = vmor %vm921_vm15, %vm922_vm0 }
 0x1c6   : > { %v918_v5 = vsub.f32 1.0, %v917_v46  ;;  %v883_v62 = vadd.f32 %v1952_v61, %v865_v12  ;;  %vm1101_vm3 = vweird.f32 %v2057_v25  ;;  %v1105_v11 = vand.u32 2147483647, %v2057_v25 }
 0x1c7   : > { %1162 = vst [vmem:[#allocation2 + $0x30] sm:$0xff] %v1020_v36  ;;  %v1054_v50 = vmul.f32 %v1352_v59, %v1053_v27  ;;  %1359 = vrcp.f32 %v2075_v49  ;;  %v1107_v37 = vand.u32 2147483648, %v2057_v25  ;;  %v873_v45 = vadd.f32 %v1952_v61, %v815_v52 }
 0x1c8   : > { %v919_v38 = vmul.f32 %v1354_v55, %v918_v5  ;;  %v899_v40 = vsub.f32 %v883_v62, %v2068_v1  ;;  %vm966_vm5 = vweird.f32 %v2060_v18  ;;  %v970_v16 = vand.u32 2147483647, %v2060_v18 }
 0x1c9   : > { %v1055_v32 = vadd.f32 %v1352_v59, %v1054_v50  ;;  %vm2102_vm6 = vcmp.eq.f32.partialorder %v1105_v11, 8.507059e+37  ;;  %v972_v41 = vand.u32 2147483648, %v2060_v18  ;;  %v889_v57 = vsub.f32 %v873_v45, %v1910_v54 }
 0x1ca   : > { %v920_v3 = vadd.f32 %v1354_v55, %v919_v38  ;;  %v1356_v35 = vpop.eup %1355  ;;  %v875_v17 = vadd.f32 %v1952_v61, %v825_v13  ;;  %vm2114_vm9 = vcmp.eq.f32.partialorder %v970_v16, 8.507059e+37  ;;  %v955_v4 = vand.u32 2147483647, %v2075_v49 }
 0x1cb   : > { %v1059_v22 = vsel %vm1058_vm2, %v1352_v59, %v1055_v32  ;;  %v1358_v14 = vpop.eup %1357  ;;  %v1097_v19 = vmul.f32 %v1356_v35, %v2057_v25  ;;  %vm1102_vm7 = vweird.f32 %v1356_v35  ;;  %v973_v46 = vor.u32 1.1754944e-38, %v972_v41 }
 0x1cc   : > { %v1064_v7 = vsel %vm2070_vm14, %v1063_v42, %v1059_v22  ;;  %v924_v56 = vsel %vm923_vm4, %v1354_v55, %v920_v3  ;;  %v962_v29 = vmul.f32 %v1358_v14, %v2060_v18  ;;  %vm967_vm8 = vweird.f32 %v1358_v14  ;;  %vm1103_vm10 = vmor %vm1101_vm3, %vm1102_vm7  ;;  %v840_v5 = vpop.permute.xlu0 %839 }
 0x1cd   : > { %v1065_v39 = vmul.f32 %v1064_v7, %v2014_v6  ;;  %v929_v31 = vsel %vm2077_vm1, %v928_v28, %v924_v56  ;;  %v830_v30 = vpop.permute.xlu1 %829  ;;  %v1098_v43 = vsub.f32 1.0, %v1097_v19  ;;  %v2107_v6 = vmax.f32 %v899_v40, 1e-08  ;;  %v1360_v53 = vpop.eup %1359  ;;  %vm968_vm11 = vmor %vm966_vm5, %vm967_vm8 }
 0x1ce   : > { %v930_v9 = vmul.f32 %v929_v31, %v1891_v20  ;;  %v963_v59 = vsub.f32 1.0, %v962_v29  ;;  %v1108_v20 = vor.u32 1.1754944e-38, %v1107_v37  ;;  %v876_v55 = vadd.f32 %v1952_v61, %v830_v30 }
 0x1cf   : > { %1165 = vst [vmem:[#allocation2 + $0x48] sm:$0xff] %v1065_v39  ;;  %v1099_v48 = vmul.f32 %v1356_v35, %v1098_v43  ;;  %v947_v51 = vmul.f32 %v1360_v53, %v2075_v49  ;;  %1361 = vrcp.f32 %v2107_v6  ;;  %v2121_v33 = vmax.f32 %v889_v57, 1e-08 }
 0x1d0   : > { %1156 = vst [vmem:[#allocation2] sm:$0xff] %v930_v9  ;;  %v964_v23 = vmul.f32 %v1358_v14, %v963_v59  ;;  %v891_v52 = vsub.f32 %v875_v17, %v1967_v0  ;;  %vm952_vm12 = vweird.f32 %v1360_v53  ;;  %v957_v50 = vand.u32 2147483648, %v2075_v49 }
 0x1d1   : > { %v1100_v47 = vadd.f32 %v1356_v35, %v1099_v48  ;;  %v948_v27 = vsub.f32 1.0, %v947_v51  ;;  %v892_v24 = vsub.f32 %v876_v55, %v1919_v10  ;;  %1363 = vrcp.f32 %v2121_v33 }
 0x1d2   : > { %v965_v36 = vadd.f32 %v1358_v14, %v964_v23  ;;  %vm951_vm13 = vweird.f32 %v2075_v49  ;;  %vm956_vm14 = vcmp.eq.f32.partialorder %v955_v4, 8.507059e+37  ;;  %v2136_v3 = vmax.f32 %v891_v52, 1e-08 }
 0x1d3   : > { %v1104_v12 = vsel %vm1103_vm10, %v1356_v35, %v1100_v47  ;;  %v949_v38 = vmul.f32 %v1360_v53, %v948_v27  ;;  %vm953_vm15 = vmor %vm951_vm13, %vm952_vm12  ;;  %v958_v11 = vor.u32 1.1754944e-38, %v957_v50  ;;  %v878_v22 = vadd.f32 %v1952_v61, %v840_v5 }
 0x1d4   : > { %v1109_v25 = vsel %vm2102_vm6, %v1108_v20, %v1104_v12  ;;  %v969_v42 = vsel %vm968_vm11, %v1358_v14, %v965_v36  ;;  %v1150_v37 = vand.u32 2147483647, %v2107_v6  ;;  %1365 = vrcp.f32 %v2136_v3  ;;  %v855_v9 = vpop.permute.xlu0 %854 }
 0x1d5   : > { %v1110_v32 = vmul.f32 %v1109_v25, %v2045_v2  ;;  %v974_v63 = vsel %vm2114_vm9, %v973_v46, %v969_v42  ;;  %v845_v18 = vpop.permute.xlu1 %844  ;;  %v1362_v28 = vpop.eup %1361  ;;  %v950_v13 = vadd.f32 %v1360_v53, %v949_v38  ;;  %v2140_v2 = vmax.f32 %v892_v24, 1e-08 }
 0x1d6   : > { %v975_v62 = vmul.f32 %v974_v63, %v1900_v21  ;;  %v1142_v35 = vmul.f32 %v1362_v28, %v2107_v6  ;;  %v1152_v21 = vand.u32 2147483648, %v2107_v6  ;;  %v1000_v14 = vand.u32 2147483647, %v2121_v33 }
 0x1d7   : > { %1168 = vst [vmem:[#allocation2 + $0x60] sm:$0xff] %v1110_v32  ;;  %v954_v49 = vsel %vm953_vm15, %v1360_v53, %v950_v13  ;;  %v1002_v7 = vand.u32 2147483648, %v2121_v33  ;;  %v1364_v56 = vpop.eup %1363  ;;  %1367 = vrcp.f32 %v2140_v2  ;;  %vm1146_vm0 = vweird.f32 %v2107_v6 }
 0x1d8   : > { %1159 = vst [vmem:[#allocation2 + $0x18] sm:$0xff] %v975_v62  ;;  %v959_v40 = vsel %vm956_vm14, %v958_v11, %v954_v49  ;;  %v1143_v45 = vsub.f32 1.0, %v1142_v35  ;;  %vm1147_vm1 = vweird.f32 %v1362_v28  ;;  %v992_v31 = vmul.f32 %v1364_v56, %v2121_v33 }
 0x1d9   : > { %v960_v19 = vmul.f32 %v959_v40, %v1934_v44  ;;  %vm2152_vm2 = vcmp.eq.f32.partialorder %v1150_v37, 8.507059e+37  ;;  %v1153_v16 = vor.u32 1.1754944e-38, %v1152_v21  ;;  %vm996_vm3 = vweird.f32 %v2121_v33  ;;  %vm1148_vm5 = vmor %vm1146_vm0, %vm1147_vm1 }
 0x1da   : > { %v1144_v39 = vmul.f32 %v1362_v28, %v1143_v45  ;;  %v894_v30 = vsub.f32 %v878_v22, %v1987_v58  ;;  %v993_v43 = vsub.f32 1.0, %v992_v31  ;;  %vm2158_vm4 = vcmp.eq.f32.partialorder %v1000_v14, 8.507059e+37  ;;  %v1366_v59 = vpop.eup %1365 }
 0x1db   : > { %1158 = vst [vmem:[#allocation2 + $0x10] sm:$0xff] %v960_v19  ;;  %v1003_v41 = vor.u32 1.1754944e-38, %v1002_v7  ;;  %vm997_vm6 = vweird.f32 %v1364_v56  ;;  %vm1026_vm7 = vweird.f32 %v2136_v3  ;;  %v879_v57 = vadd.f32 %v1952_v61, %v845_v18 }
 0x1dc   : > { %v1145_v44 = vadd.f32 %v1362_v28, %v1144_v39  ;;  %v2163_v6 = vmax.f32 %v894_v30, 1e-08  ;;  %v994_v53 = vmul.f32 %v1364_v56, %v993_v43  ;;  %v1022_v48 = vmul.f32 %v1366_v59, %v2136_v3  ;;  %vm998_vm8 = vmor %vm996_vm3, %vm997_vm6 }
 0x1dd   : > { %v881_v20 = vadd.f32 %v1952_v61, %v855_v9  ;;  %v860_v55 = vpop.permute.xlu1 %859  ;;  %v1368_v23 = vpop.eup %1367  ;;  %v1030_v47 = vand.u32 2147483647, %v2136_v3  ;;  %v1032_v26 = vand.u32 2147483648, %v2136_v3  ;;  %vm1027_vm9 = vweird.f32 %v1366_v59 }
 0x1de   : > { %v1149_v17 = vsel %vm1148_vm5, %v1362_v28, %v1145_v44  ;;  %1369 = vrcp.f32 %v2163_v6  ;;  %v995_v4 = vadd.f32 %v1364_v56, %v994_v53  ;;  %v1023_v36 = vsub.f32 1.0, %v1022_v48  ;;  %vm1028_vm11 = vmor %vm1026_vm7, %vm1027_vm9 }
 0x1df   : > { %v1154_v51 = vsel %vm2152_vm2, %v1153_v16, %v1149_v17  ;;  %v1037_v27 = vmul.f32 %v1368_v23, %v2140_v2  ;;  %v1045_v52 = vand.u32 2147483647, %v2140_v2  ;;  %v895_v5 = vsub.f32 %v879_v57, %v1932_v60 }
 0x1e0   : > { %v1155_v46 = vmul.f32 %v1154_v51, %v2068_v1  ;;  %v882_v12 = vadd.f32 %v1952_v61, %v860_v55  ;;  %v999_v50 = vsel %vm998_vm8, %v1364_v56, %v995_v4  ;;  %v1024_v24 = vmul.f32 %v1366_v59, %v1023_v36 }
 0x1e1   : > { %v1038_v25 = vsub.f32 1.0, %v1037_v27  ;;  %v897_v1 = vsub.f32 %v881_v20, %v2021_v8  ;;  %v1004_v42 = vsel %vm2158_vm4, %v1003_v41, %v999_v50  ;;  %vm1042_vm10 = vweird.f32 %v1368_v23 }
 0x1e2   : > { %1171 = vst [vmem:[#allocation2 + $0x78] sm:$0xff] %v1155_v46  ;;  %v1047_v33 = vand.u32 2147483648, %v2140_v2  ;;  %v2185_v38 = vmax.f32 %v895_v5, 1e-08  ;;  %v1005_v32 = vmul.f32 %v1004_v42, %v1910_v54  ;;  %v1025_v63 = vadd.f32 %v1366_v59, %v1024_v24 }
 0x1e3   : > { %v1039_v18 = vmul.f32 %v1368_v23, %v1038_v25  ;;  %v2188_v28 = vmax.f32 %v897_v1, 1e-08  ;;  %v1033_v62 = vor.u32 1.1754944e-38, %v1032_v26  ;;  %vm1041_vm12 = vweird.f32 %v2140_v2 }
 0x1e4   : > { %v1370_v61 = vpop.eup %1369  ;;  %1371 = vrcp.f32 %v2185_v38  ;;  %v898_v13 = vsub.f32 %v882_v12, %v1954_v34  ;;  %1161 = vst [vmem:[#allocation2 + $0x28] sm:$0xff] %v1005_v32  ;;  %v1029_v11 = vsel %vm1028_vm11, %v1366_v59, %v1025_v63  ;;  %vm1031_vm13 = vcmp.eq.f32.partialorder %v1030_v47, 8.507059e+37  ;;  %vm1043_vm14 = vmor %vm1041_vm12, %vm1042_vm10 }
 0x1e5   : > { %v1040_v54 = vadd.f32 %v1368_v23, %v1039_v18  ;;  %v1067_v35 = vmul.f32 %v1370_v61, %v2163_v6  ;;  %v1034_v22 = vsel %vm1031_vm13, %v1033_v62, %v1029_v11  ;;  %v1048_v49 = vor.u32 1.1754944e-38, %v1047_v33 }
 0x1e6   : > { %1373 = vrcp.f32 %v2188_v28  ;;  %v1035_v3 = vmul.f32 %v1034_v22, %v1967_v0  ;;  %vm1046_vm15 = vcmp.eq.f32.partialorder %v1045_v52, 8.507059e+37  ;;  %v1075_v40 = vand.u32 2147483647, %v2163_v6 }
 0x1e7   : > { %v1044_v37 = vsel %vm1043_vm14, %v1368_v23, %v1040_v54  ;;  %v1068_v2 = vsub.f32 1.0, %v1067_v35  ;;  %v1077_v45 = vand.u32 2147483648, %v2163_v6  ;;  %v2202_v14 = vmax.f32 %v898_v13, 1e-08 }
 0x1e8   : > { %v1049_v21 = vsel %vm1046_vm15, %v1048_v49, %v1044_v37  ;;  %1163 = vst [vmem:[#allocation2 + $0x38] sm:$0xff] %v1035_v3  ;;  %vm1072_vm0 = vweird.f32 %v1370_v61  ;;  %v1172_v19 = vlaneseq  ;;  %vm1071_vm1 = vweird.f32 %v2163_v6 }
 0x1e9   : > { %v1050_v7 = vmul.f32 %v1049_v21, %v1919_v10  ;;  %v1069_v56 = vmul.f32 %v1370_v61, %v1068_v2  ;;  %1375 = vrcp.f32 %v2202_v14  ;;  %vm1073_vm2 = vmor %vm1071_vm1, %vm1072_vm0  ;;  %v1078_v16 = vor.u32 1.1754944e-38, %v1077_v45 }
 0x1ea   : > { %v1372_v39 = vpop.eup %1371  ;;  %v2208_v30 = vand.u32 127, %v1172_v19  ;;  %vm1076_vm3 = vcmp.eq.f32.partialorder %v1075_v40, 8.507059e+37  ;;  %v1090_v15 = vand.u32 2147483647, %v2185_v38  ;;  %v1092_v41 = vand.u32 2147483648, %v2185_v38 }
 0x1eb   : > { %1164 = vst [vmem:[#allocation2 + $0x40] sm:$0xff] %v1050_v7  ;;  %v1070_v0 = vadd.f32 %v1370_v61, %v1069_v56  ;;  %v1082_v31 = vmul.f32 %v1372_v39, %v2185_v38  ;;  %v1120_v59 = vand.u32 2147483647, %v2188_v28  ;;  %vm1087_vm4 = vweird.f32 %v1372_v39 }
 0x1ec   : > { %v1374_v29 = vpop.eup %1373  ;;  %vm1086_vm5 = vweird.f32 %v2185_v38  ;;  %v1122_v48 = vand.u32 2147483648, %v2188_v28  ;;  %vm1091_vm8 = vcmp.eq.f32.partialorder %v1090_v15, 8.507059e+37  ;;  %v1093_v51 = vor.u32 1.1754944e-38, %v1092_v41 }
 0x1ed   : > { %v1074_v9 = vsel %vm1073_vm2, %v1370_v61, %v1070_v0  ;;  %v1083_v10 = vsub.f32 1.0, %v1082_v31  ;;  %v1112_v44 = vmul.f32 %v1374_v29, %v2188_v28  ;;  %vm1117_vm6 = vweird.f32 %v1374_v29  ;;  %vm1088_vm7 = vmor %vm1086_vm5, %vm1087_vm4 }
 0x1ee   : > { %v1079_v43 = vsel %vm1076_vm3, %v1078_v16, %v1074_v9  ;;  %vm1116_vm9 = vweird.f32 %v2188_v28  ;;  %vm1121_vm10 = vcmp.eq.f32.partialorder %v1120_v59, 8.507059e+37  ;;  %v1123_v4 = vor.u32 1.1754944e-38, %v1122_v48 }
 0x1ef   : > { %v1080_v6 = vmul.f32 %v1079_v43, %v1987_v58  ;;  %v1084_v57 = vmul.f32 %v1372_v39, %v1083_v10  ;;  %v1113_v17 = vsub.f32 1.0, %v1112_v44  ;;  %v1376_v53 = vpop.eup %1375  ;;  %vm1118_vm11 = vmor %vm1116_vm9, %vm1117_vm6  ;;  %v1135_v36 = vand.u32 2147483647, %v2202_v14 }
 0x1f0   : > { %v1127_v23 = vmul.f32 %v1376_v53, %v2202_v14  ;;  %v1137_v27 = vand.u32 2147483648, %v2202_v14  ;;  %vm1132_vm12 = vweird.f32 %v1376_v53  ;;  %vm1131_vm13 = vweird.f32 %v2202_v14 }
 0x1f1   : > { %1166 = vst [vmem:[#allocation2 + $0x50] sm:$0xff] %v1080_v6  ;;  %v1085_v20 = vadd.f32 %v1372_v39, %v1084_v57  ;;  %v1114_v55 = vmul.f32 %v1374_v29, %v1113_v17  ;;  %vm1133_vm14 = vmor %vm1131_vm13, %vm1132_vm12  ;;  %vm1136_vm15 = vcmp.eq.f32.partialorder %v1135_v36, 8.507059e+37 }
 0x1f2   : > { %v1128_v26 = vsub.f32 1.0, %v1127_v23  ;;  %v1138_v1 = vor.u32 1.1754944e-38, %v1137_v27 }
 0x1f3   : > { %v1089_v58 = vsel %vm1088_vm7, %v1372_v39, %v1085_v20  ;;  %v1115_v47 = vadd.f32 %v1374_v29, %v1114_v55 }
 0x1f4   : > { %v1094_v46 = vsel %vm1091_vm8, %v1093_v51, %v1089_v58  ;;  %v1129_v12 = vmul.f32 %v1376_v53, %v1128_v26 }
 0x1f5   : > { %v1095_v52 = vmul.f32 %v1094_v46, %v1932_v60  ;;  %v1119_v5 = vsel %vm1118_vm11, %v1374_v29, %v1115_v47  ;;  %v2283_v60 = vld [vmem:[#allocation3_spill] sm:$0xff] }
 0x1f6   : > { %v1124_v50 = vsel %vm1121_vm10, %v1123_v4, %v1119_v5  ;;  %v1130_v25 = vadd.f32 %v1376_v53, %v1129_v12  ;;  %v1393_v32 = vmov %v2283_v60  }
 0x1f7   : > { %1167 = vst [vmem:[#allocation2 + $0x58] sm:$0xff] %v1095_v52  ;;  %v1125_v24 = vmul.f32 %v1124_v50, %v2021_v8 }
 0x1f8   : > { %v1134_v42 = vsel %vm1133_vm14, %v1376_v53, %v1130_v25 }
 0x1f9   : > { %1169 = vst [vmem:[#allocation2 + $0x68] sm:$0xff] %v1125_v24  ;;  %v1139_v33 = vsel %vm1136_vm15, %v1138_v1, %v1134_v42 }
 0x1fa   : > { %v1140_v38 = vmul.f32 %v1139_v33, %v1954_v34 }
 0x1fc   : > { %1170 = vst [vmem:[#allocation2 + $0x70] sm:$0xff] %v1140_v38 }
 0x1fd LB: >> { %v1184_v8 = vstv %s1399_s30  ;;  %vm1186_vm0 = vcmp.gt.f32.partialorder %v1395_v32, 0.5  ;;  %s1182_s4 = scalar_lea.vmem [#allocation2], %s1399_s30  ;;  %vm1191_vm4 = vcmask 1040384   ;;  %v1407_v34 = vmov 0.0   ;;  %s1180_s30 = sadd.s32 1, %s1399_s30   ;;  %s1399_s30 = sphi %s2226_s30, %s1180_s30   ;;  %v1395_v32 = vphi %v1393_v32, %v1394_v32  }
 0x1fe   : >> { %vm1185_vm1 = vcmp.lt.s32.totalorder %v2208_v30, %v1184_v8  ;;  %vm1203_vm6 = vcmp.eq.s32.totalorder %v2208_v30, %v1184_v8  ;;  %p1177_p5 = scmp.ge.s32.totalorder %s1180_s30, 128  }
 0x1ff   : >> { %vm1187_vm2 = vmand %vm1185_vm1, %vm1186_vm0 }
 0x203   : >> { %v1183_v63 = vld [vmem:[%s1182_s4] sm:$0x1] }
 0x204   : >> { %vm1188_vm3 = vcmp.gt.f32.partialorder %v1183_v63, 0.7 }
 0x205   : >> { %vm1189_vm5 = vmand %vm1187_vm2, %vm1188_vm3 }
 0x206   : >> { %v1190_v18 = vsel %vm1189_vm5, 1.0, %v1407_v34 }
 0x207   : >> { %v1192_v28 = vsel %vm1191_vm4, %v1190_v18, -inf }
 0x208   : >> { %1193 = vmax.xlane.f32.xlu0 %v1192_v28 }
 0x27b   : >> { %v1194_v61 = vpop.xlane.xlu0 %1193 }
 0x27c   : >> { %v1195_v62 = vrot.slane %v1194_v61, 4 }
 0x27e   : >> { %v1196_v13 = vmax.f32 %v1194_v61, %v1195_v62 }
 0x280   : >> { %v1197_v11 = vrot.slane %v1196_v13, 2 }
 0x282   : >> { %v1198_v54 = vmax.f32 %v1196_v13, %v1197_v11 }
 0x284   : >> { %v1199_v35 = vrot.slane %v1198_v54, 1 }
 0x286   : >> { %v1200_v22 = vmax.f32 %v1198_v54, %v1199_v35 }
 0x288   : >> { %1298 = vpush %v1200_v22 }
 0x2b9   : >> { %s1299_s5 = spop %1298 }
 0x2ba   : >> { %p1202_p4 = scmp.gt.f32.partialorder %s1299_s5, 0.5 }
 0x2bc   : >> { %s1204_s6 = scalar_select %p1202_p4, 1, 0 }
 0x2be   : >> { %v1205_v49 = vstv %s1204_s6  ;;  %1179 = sbr.rel (!%p1177_p5) target bundleno = 509 (0x1fd), region = 76 }
 0x2bf   : >> { %vm1206_vm7 = vcmp.eq.s32.totalorder %v1205_v49, 1 }
 0x2c0   : >> { %vm1207_vm8 = vmand %vm1203_vm6, %vm1206_vm7 }
 0x2c1   : >> { %v1208_v3 = vsel %vm1207_vm8, 0.0, %v1395_v32  }
 0x2c2   : >> { %v1394_v32 = vmov %v1208_v3   ;;  %1209 = vst [vmem:[%s197_s23] sm:$0x1] (%p1177_p5), %v1208_v3 }
 0x2c3 PF: > { %s13_s12 = sadd.s32 1, %s1391_s12  }
 0x2c4   : > { %p10_p6 = scmp.ge.s32.totalorder %s13_s12, 4  }
 0x2c6   :  { %12 = sbr.rel (!%p10_p6) target bundleno = 1 (0x1), region = 87 }

</bundles_post_ra>
